<compile_context>
chip_gen: v7x
topology: tpu7x:2x2x1
jax: 0.10.0
libtpu: 0.0.40
codegen_flags: <defaults>
</compile_context>

<pallas_src>
import jax
import jax.numpy as jnp
from jax.experimental import pallas as pl
from jax.experimental.pallas import tpu as pltpu


# ----------------------------------------------------------------------------
# The single fused kernel: conv1 + conv2 + conv3 + linear for TB images.
#
# Activation layout for every conv layer l:
#   buf[r, q*TB + t, :]  =  zero-padded input row  p = 2*q + r  of image t,
#   where padded row p corresponds to data row i = p - 2 (p in {0,1,H+2,H+3}
#   are the zero pad rows).  Output row i' of the conv then needs padded rows
#   2*i' + dy, dy = 0..4, i.e. for tap dy the whole GEMM lhs is the contiguous
#   slab  buf[dy % 2, (dy//2)*TB : (dy//2 + H_out)*TB, :].
# ----------------------------------------------------------------------------
def _fused_encoder_kernel(x_ref,
                          k1_ref, b1_ref,
                          k2_ref, b2_ref,
                          k3_ref, b3_ref,
                          wl_ref, bo_ref,
                          o_ref,
                          s2_ref, s3_ref):
    TB = x_ref.shape[1] // 16                      # images per grid step
    w23 = s2_ref.shape[2]                          # 14*dim lanes (conv2/conv3 inputs)
    zero_slab = jnp.zeros((TB, w23), jnp.bfloat16)

    def conv(buf_ref, h_out, k_ref, b_ref):
        # buf_ref : [2, n_slabs*TB, W_in*C_in]  parity-split padded rows (bf16)
        # returns   [h_out*TB, W_out*C_out]     relu(conv) in bf16
        acc = None
        for dy in range(5):                                        # static unroll
            lhs = buf_ref[dy % 2, pl.ds((dy // 2) * TB, h_out * TB), :]
            p = jnp.dot(lhs, k_ref[dy], preferred_element_type=jnp.float32)
            acc = p if acc is None else acc + p
        acc = acc + b_ref[...]                                     # f32 bias, bcast over rows
        return jnp.maximum(acc, 0.0).astype(jnp.bfloat16)

    # ---- conv1: 28x28x1 -> 14x14xdim (input block already padded by wrapper)
    a1 = conv(x_ref, 14, k1_ref, b1_ref)           # [14*TB, 14*dim]

    # ---- stage conv1 output as conv2's parity-split padded input (H_in=14)
    for r in (0, 1):
        s2_ref[r, pl.ds(0, TB), :] = zero_slab                     # padded rows 0 / 1
        s2_ref[r, pl.ds(8 * TB, TB), :] = zero_slab                # padded rows 16 / 17
    for i in range(14):                                            # data row i -> slab 1+i//2
        s2_ref[i % 2, pl.ds((1 + i // 2) * TB, TB), :] = a1[i * TB:(i + 1) * TB, :]

    # ---- conv2: 14x14xdim -> 7x7x2dim
    a2 = conv(s2_ref, 7, k2_ref, b2_ref)           # [7*TB, 14*dim]

    # ---- stage conv2 output as conv3's parity-split padded input (H_in=7)
    s3_ref[0, pl.ds(0, TB), :] = zero_slab                         # padded row 0
    s3_ref[0, pl.ds(5 * TB, TB), :] = zero_slab                    # padded row 10
    s3_ref[1, pl.ds(0, TB), :] = zero_slab                         # padded row 1
    s3_ref[1, pl.ds(4 * TB, TB), :] = zero_slab                    # padded row 9
    for i in range(7):
        s3_ref[i % 2, pl.ds((1 + i // 2) * TB, TB), :] = a2[i * TB:(i + 1) * TB, :]

    # ---- conv3: 7x7x2dim -> 4x4x4dim
    a3 = conv(s3_ref, 4, k3_ref, b3_ref)           # [4*TB, 16*dim]

    # ---- Linear(4*4*4dim -> dim): one M=TB GEMM per spatial row h, f32 accumulate
    acc = None
    for h in range(4):
        p = jnp.dot(a3[h * TB:(h + 1) * TB, :], wl_ref[h],
                    preferred_element_type=jnp.float32)
        acc = p if acc is None else acc + p
    o_ref[...] = (acc + bo_ref[...]).astype(o_ref.dtype)           # [TB, dim]


# ----------------------------------------------------------------------------
# One-time parameter preprocessing (hoisted out of the forward hot path).
# ----------------------------------------------------------------------------
def _col_weight(w, w_in, w_out, dtype):
    # w: [cout, cin, 5, 5] (PyTorch OIHW) ->
    # K[dy, (j, c), (j', o)] = w[o, c, dy, j - 2*j' + 2]  if 0 <= j-2j'+2 < 5 else 0
    cout, cin = int(w.shape[0]), int(w.shape[1])
    dx = jnp.arange(5)[:, None, None]
    j_in = jnp.arange(w_in)[None, :, None]
    j_out = jnp.arange(w_out)[None, None, :]
    sel = (j_in == 2 * j_out + dx - 2).astype(jnp.float32)         # [5, w_in, w_out]
    k = jnp.einsum("xjk,ocdx->djcko", sel, w.astype(jnp.float32))
    return k.reshape(5, w_in * cin, w_out * cout).astype(dtype)


def prepare_params(params, dim, dtype=jnp.bfloat16):
    """Build MXU-ready constant operands once (not per forward call)."""
    w_out = params["w_out"].astype(jnp.float32)                    # [dim, 4*4*4*dim], NCHW flatten
    wl = (w_out.reshape(dim, 4 * dim, 4, 4)                        # [o, c, h, w]
          .transpose(2, 3, 1, 0)                                   # [h, w, c, o]
          .reshape(4, 4 * 4 * dim, dim))                           # lane order (w, c) matches act3
    return {
        "k1": _col_weight(params["w1"], 28, 14, dtype),            # [5, 28,      14*dim]
        "b1": jnp.tile(params["b1"].astype(jnp.float32), 14).reshape(1, 14 * dim),
        "k2": _col_weight(params["w2"], 14, 7, dtype),             # [5, 14*dim,  14*dim]
        "b2": jnp.tile(params["b2"].astype(jnp.float32), 7).reshape(1, 14 * dim),
        "k3": _col_weight(params["w3"], 7, 4, dtype),              # [5, 14*dim,  16*dim]
        "b3": jnp.tile(params["b3"].astype(jnp.float32), 4).reshape(1, 16 * dim),
        "wl": wl.astype(dtype),                                    # [4, 16*dim, dim]
        "bo": params["b_out"].astype(jnp.float32).reshape(1, dim),
    }


# ----------------------------------------------------------------------------
# Forward pass wrapper: one pallas_call for the whole network.
# ----------------------------------------------------------------------------
def _round_up(n, m):
    return (n + m - 1) // m * m


def _const_spec(a):
    if a.ndim == 2:
        return pl.BlockSpec(a.shape, lambda b: (0, 0))
    return pl.BlockSpec(a.shape, lambda b: (0, 0, 0))


def mnist_encoder_forward(x, prep):
    dim = prep["bo"].shape[1]

    # matches input.view(-1, 1, 28, 28); bf16 halves input HBM traffic
    xb = x.reshape(-1, 28, 28).astype(jnp.bfloat16)
    B = xb.shape[0]
    TB = min(256, _round_up(B, 16))                 # images per grid step (mult. of 16)
    Bp = _round_up(B, TB)
    nb = Bp // TB
    if Bp != B:
        xb = jnp.pad(xb, ((0, Bp - B), (0, 0), (0, 0)))

    # Host-side prep (fused XLA op): transpose batch under spatial rows, split
    # rows by parity and add the 2-row zero padding, so the kernel can read
    # layer-1's padded parity buffer straight from the input block.
    xb = xb.reshape(nb, TB, 28, 28).transpose(0, 2, 1, 3)          # (nb, 28, TB, 28)
    z = jnp.zeros((nb, 1, TB, 28), jnp.bfloat16)
    xe = jnp.concatenate([z, xb[:, 0::2], z], axis=1)              # (nb, 16, TB, 28)
    xo = jnp.concatenate([z, xb[:, 1::2], z], axis=1)              # (nb, 16, TB, 28)
    xp = jnp.stack([xe, xo], axis=1).reshape(nb * 2, 16 * TB, 28)  # (nb*2, 16*TB, 28)

    names = ("k1", "b1", "k2", "b2", "k3", "b3", "wl", "bo")
    in_specs = [pl.BlockSpec((2, 16 * TB, 28), lambda b: (b, 0, 0))]
    in_specs += [_const_spec(prep[n]) for n in names]              # constant blocks

    out = pl.pallas_call(
        _fused_encoder_kernel,
        out_shape=jax.ShapeDtypeStruct((Bp, dim), jnp.float32),
        grid=(nb,),                                                # TB images per step
        in_specs=in_specs,
        out_specs=pl.BlockSpec((TB, dim), lambda b: (b, 0)),
        scratch_shapes=[
            pltpu.VMEM((2, 9 * TB, 14 * dim), jnp.bfloat16),       # conv2 padded input
            pltpu.VMEM((2, 6 * TB, 14 * dim), jnp.bfloat16),       # conv3 padded input
        ],
        compiler_params=pltpu.CompilerParams(
            dimension_semantics=("parallel",)),                    # both TCs on v7x
    )(xp, *[prep[n] for n in names])
    return out[:B]


# ----------------------------------------------------------------------------
# Pure-JAX f32 reference (matches the PyTorch module in eval mode).
# ----------------------------------------------------------------------------
def reference_forward(x, params):
    h = x.reshape(-1, 1, 28, 28).astype(jnp.float32)

    def conv(h, w, b):
        y = jax.lax.conv_general_dilated(
            h, w.astype(jnp.float32), window_strides=(2, 2),
            padding=((2, 2), (2, 2)),
            dimension_numbers=("NCHW", "OIHW", "NCHW"),
            precision=jax.lax.Precision.HIGHEST)
        return jax.nn.relu(y + b[None, :, None, None])

    h = conv(h, params["w1"], params["b1"])
    h = conv(h, params["w2"], params["b2"])
    h = conv(h, params["w3"], params["b3"])
    h = h.reshape(h.shape[0], -1)                                  # NCHW flatten (c, h, w)
    return jnp.dot(h, params["w_out"].T,
                   precision=jax.lax.Precision.HIGHEST) + params["b_out"]


# ----------------------------------------------------------------------------
# Deterministic synthetic parameters (shapes from MNISTencoder.__init__).
# ----------------------------------------------------------------------------
def init_params(key, dim):
    ks = jax.random.split(key, 8)

    def u(k, shape, fan_in):
        bound = 1.0 / jnp.sqrt(float(fan_in))
        return jax.random.uniform(k, shape, jnp.float32, -bound, bound)

    return {
        "w1": u(ks[0], (dim, 1, 5, 5), 1 * 25),
        "b1": u(ks[1], (dim,), 1 * 25),
        "w2": u(ks[2], (2 * dim, dim, 5, 5), dim * 25),
        "b2": u(ks[3], (2 * dim,), dim * 25),
        "w3": u(ks[4], (4 * dim, 2 * dim, 5, 5), 2 * dim * 25),
        "b3": u(ks[5], (4 * dim,), 2 * dim * 25),
        "w_out": u(ks[6], (dim, 4 * 4 * 4 * dim), 4 * 4 * 4 * dim),
        "b_out": u(ks[7], (dim,), 4 * 4 * 4 * dim),
    }


def _check(fwd, x, params, dim):
    out = jax.block_until_ready(fwd(x, prepare_params(params, dim)))
    assert out.shape == (x.shape[0], dim), out.shape
    ref = jax.block_until_ready(reference_forward(x, params))
    err = float(jnp.max(jnp.abs(out - ref)))
    scale = float(jnp.max(jnp.abs(ref))) + 1e-6
    assert err <= 0.02 + 0.02 * scale, f"max abs err {err} (ref scale {scale})"


if __name__ == "__main__":
    dim = 8          # args.dim (small)
    key = jax.random.PRNGKey(0)
    k_x, k_x2, k_p = jax.random.split(key, 3)
    params = init_params(k_p, dim)

    fwd = jax.jit(mnist_encoder_forward)

    # Small batch (pads internally to TB=16, single grid step).
    x_small = jax.random.normal(k_x, (2, 1, 28, 28), jnp.float32)
    _check(fwd, x_small, params, dim)

    # Larger batch: exercises TB=256, a 2-step grid, and batch padding.
    x_big = jax.random.normal(k_x2, (300, 1, 28, 28), jnp.float32)
    _check(fwd, x_big, params, dim)

    print("KERNEL_OK")
</pallas_src>

<mosaic_0001>
module attributes {stable_mosaic.version = 11 : i64} {
  func.func @_fused_encoder_kernel(%arg0: i32, %arg1: memref<2x256x28xbf16, #tpu.memory_space<vmem>>, %arg2: memref<5x28x112xbf16, #tpu.memory_space<vmem>>, %arg3: memref<1x112xf32, #tpu.memory_space<vmem>>, %arg4: memref<5x112x112xbf16, #tpu.memory_space<vmem>>, %arg5: memref<1x112xf32, #tpu.memory_space<vmem>>, %arg6: memref<5x112x128xbf16, #tpu.memory_space<vmem>>, %arg7: memref<1x128xf32, #tpu.memory_space<vmem>>, %arg8: memref<4x128x8xbf16, #tpu.memory_space<vmem>>, %arg9: memref<1x8xf32, #tpu.memory_space<vmem>>, %arg10: memref<16x8xf32, #tpu.memory_space<vmem>>, %arg11: memref<2x144x112xbf16, #tpu.memory_space<vmem>>, %arg12: memref<2x96x112xbf16, #tpu.memory_space<vmem>>) attributes {dimension_semantics = [#tpu.dimension_semantics<parallel>], iteration_bounds = array<i64: 1>, scalar_prefetch = 0 : i64, scratch_operands = 2 : i64, tpu.core_type = #tpu.core_type<tc>, window_params = [{transform_indices = @transform_0, window_bounds = array<i64: 2, 256, 28>}, {pipeline_mode = #tpu.pipeline_mode<synchronous>, transform_indices = @transform_1, window_bounds = array<i64: 5, 28, 112>}, {pipeline_mode = #tpu.pipeline_mode<synchronous>, transform_indices = @transform_2, window_bounds = array<i64: 1, 112>}, {pipeline_mode = #tpu.pipeline_mode<synchronous>, transform_indices = @transform_3, window_bounds = array<i64: 5, 112, 112>}, {pipeline_mode = #tpu.pipeline_mode<synchronous>, transform_indices = @transform_4, window_bounds = array<i64: 1, 112>}, {pipeline_mode = #tpu.pipeline_mode<synchronous>, transform_indices = @transform_5, window_bounds = array<i64: 5, 112, 128>}, {pipeline_mode = #tpu.pipeline_mode<synchronous>, transform_indices = @transform_6, window_bounds = array<i64: 1, 128>}, {pipeline_mode = #tpu.pipeline_mode<synchronous>, transform_indices = @transform_7, window_bounds = array<i64: 4, 128, 8>}, {pipeline_mode = #tpu.pipeline_mode<synchronous>, transform_indices = @transform_8, window_bounds = array<i64: 1, 8>}, {transform_indices = @transform_9, window_bounds = array<i64: 16, 8>}]} {
    %cst = arith.constant 0.000000e+00 : bf16
    %0 = vector.broadcast %cst : bf16 to vector<16x112xbf16>
    %c0 = arith.constant 0 : index
    %c0_0 = arith.constant 0 : index
    %c0_1 = arith.constant 0 : index
    %1 = vector.load %arg1[%c0, %c0_0, %c0_1] : memref<2x256x28xbf16, #tpu.memory_space<vmem>>, vector<1x224x28xbf16>
    %2 = vector.shape_cast %1 : vector<1x224x28xbf16> to vector<224x28xbf16>
    %c0_2 = arith.constant 0 : index
    %c0_3 = arith.constant 0 : index
    %c0_4 = arith.constant 0 : index
    %3 = vector.load %arg2[%c0_2, %c0_3, %c0_4] : memref<5x28x112xbf16, #tpu.memory_space<vmem>>, vector<1x28x112xbf16>
    %4 = vector.shape_cast %3 : vector<1x28x112xbf16> to vector<28x112xbf16>
    %cst_5 = arith.constant dense<0.000000e+00> : vector<224x112xf32>
    %5 = tpu.matmul %2, %4, %cst_5 {dimension_numbers = #tpu.dot_dimension_numbers<[1], [0], [0], [1], [0, 0, 1, 1], [], []>} : vector<224x28xbf16>, vector<28x112xbf16>, vector<224x112xf32> -> vector<224x112xf32>
    %c1 = arith.constant 1 : index
    %c0_6 = arith.constant 0 : index
    %c0_7 = arith.constant 0 : index
    %6 = vector.load %arg1[%c1, %c0_6, %c0_7] : memref<2x256x28xbf16, #tpu.memory_space<vmem>>, vector<1x224x28xbf16>
    %7 = vector.shape_cast %6 : vector<1x224x28xbf16> to vector<224x28xbf16>
    %c1_8 = arith.constant 1 : index
    %c0_9 = arith.constant 0 : index
    %c0_10 = arith.constant 0 : index
    %8 = vector.load %arg2[%c1_8, %c0_9, %c0_10] : memref<5x28x112xbf16, #tpu.memory_space<vmem>>, vector<1x28x112xbf16>
    %9 = vector.shape_cast %8 : vector<1x28x112xbf16> to vector<28x112xbf16>
    %cst_11 = arith.constant dense<0.000000e+00> : vector<224x112xf32>
    %10 = tpu.matmul %7, %9, %cst_11 {dimension_numbers = #tpu.dot_dimension_numbers<[1], [0], [0], [1], [0, 0, 1, 1], [], []>} : vector<224x28xbf16>, vector<28x112xbf16>, vector<224x112xf32> -> vector<224x112xf32>
    %11 = arith.addf %5, %10 : vector<224x112xf32>
    %c0_12 = arith.constant 0 : index
    %c16 = arith.constant 16 : index
    %c0_13 = arith.constant 0 : index
    %12 = vector.load %arg1[%c0_12, %c16, %c0_13] : memref<2x256x28xbf16, #tpu.memory_space<vmem>>, vector<1x224x28xbf16>
    %13 = vector.shape_cast %12 : vector<1x224x28xbf16> to vector<224x28xbf16>
    %c2 = arith.constant 2 : index
    %c0_14 = arith.constant 0 : index
    %c0_15 = arith.constant 0 : index
    %14 = vector.load %arg2[%c2, %c0_14, %c0_15] : memref<5x28x112xbf16, #tpu.memory_space<vmem>>, vector<1x28x112xbf16>
    %15 = vector.shape_cast %14 : vector<1x28x112xbf16> to vector<28x112xbf16>
    %cst_16 = arith.constant dense<0.000000e+00> : vector<224x112xf32>
    %16 = tpu.matmul %13, %15, %cst_16 {dimension_numbers = #tpu.dot_dimension_numbers<[1], [0], [0], [1], [0, 0, 1, 1], [], []>} : vector<224x28xbf16>, vector<28x112xbf16>, vector<224x112xf32> -> vector<224x112xf32>
    %17 = arith.addf %11, %16 : vector<224x112xf32>
    %c1_17 = arith.constant 1 : index
    %c16_18 = arith.constant 16 : index
    %c0_19 = arith.constant 0 : index
    %18 = vector.load %arg1[%c1_17, %c16_18, %c0_19] : memref<2x256x28xbf16, #tpu.memory_space<vmem>>, vector<1x224x28xbf16>
    %19 = vector.shape_cast %18 : vector<1x224x28xbf16> to vector<224x28xbf16>
    %c3 = arith.constant 3 : index
    %c0_20 = arith.constant 0 : index
    %c0_21 = arith.constant 0 : index
    %20 = vector.load %arg2[%c3, %c0_20, %c0_21] : memref<5x28x112xbf16, #tpu.memory_space<vmem>>, vector<1x28x112xbf16>
    %21 = vector.shape_cast %20 : vector<1x28x112xbf16> to vector<28x112xbf16>
    %cst_22 = arith.constant dense<0.000000e+00> : vector<224x112xf32>
    %22 = tpu.matmul %19, %21, %cst_22 {dimension_numbers = #tpu.dot_dimension_numbers<[1], [0], [0], [1], [0, 0, 1, 1], [], []>} : vector<224x28xbf16>, vector<28x112xbf16>, vector<224x112xf32> -> vector<224x112xf32>
    %23 = arith.addf %17, %22 : vector<224x112xf32>
    %c0_23 = arith.constant 0 : index
    %c32 = arith.constant 32 : index
    %c0_24 = arith.constant 0 : index
    %24 = vector.load %arg1[%c0_23, %c32, %c0_24] : memref<2x256x28xbf16, #tpu.memory_space<vmem>>, vector<1x224x28xbf16>
    %25 = vector.shape_cast %24 : vector<1x224x28xbf16> to vector<224x28xbf16>
    %c4 = arith.constant 4 : index
    %c0_25 = arith.constant 0 : index
    %c0_26 = arith.constant 0 : index
    %26 = vector.load %arg2[%c4, %c0_25, %c0_26] : memref<5x28x112xbf16, #tpu.memory_space<vmem>>, vector<1x28x112xbf16>
    %27 = vector.shape_cast %26 : vector<1x28x112xbf16> to vector<28x112xbf16>
    %cst_27 = arith.constant dense<0.000000e+00> : vector<224x112xf32>
    %28 = tpu.matmul %25, %27, %cst_27 {dimension_numbers = #tpu.dot_dimension_numbers<[1], [0], [0], [1], [0, 0, 1, 1], [], []>} : vector<224x28xbf16>, vector<28x112xbf16>, vector<224x112xf32> -> vector<224x112xf32>
    %29 = arith.addf %23, %28 : vector<224x112xf32>
    %c0_28 = arith.constant 0 : index
    %c0_29 = arith.constant 0 : index
    %30 = vector.load %arg3[%c0_28, %c0_29] : memref<1x112xf32, #tpu.memory_space<vmem>>, vector<1x112xf32>
    %31 = vector.broadcast %30 : vector<1x112xf32> to vector<224x112xf32>
    %32 = arith.addf %29, %31 : vector<224x112xf32>
    %cst_30 = arith.constant 0.000000e+00 : f32
    %33 = vector.broadcast %cst_30 : f32 to vector<224x112xf32>
    %34 = arith.maximumf %32, %33 : vector<224x112xf32>
    %35 = arith.truncf %34 : vector<224x112xf32> to vector<224x112xbf16>
    %c0_31 = arith.constant 0 : index
    %c0_32 = arith.constant 0 : index
    %c0_33 = arith.constant 0 : index
    %36 = vector.load %arg11[%c0_31, %c0_32, %c0_33] : memref<2x144x112xbf16, #tpu.memory_space<vmem>>, vector<1x16x112xbf16>
    %37 = vector.shape_cast %36 : vector<1x16x112xbf16> to vector<16x112xbf16>
    %38 = vector.shape_cast %0 : vector<16x112xbf16> to vector<1x16x112xbf16>
    tpu.vector_store %arg11[%c0_31, %c0_32, %c0_33], %38 {strides = array<i32>} : memref<2x144x112xbf16, #tpu.memory_space<vmem>>, vector<1x16x112xbf16>,
    %c0_34 = arith.constant 0 : index
    %c128 = arith.constant 128 : index
    %c0_35 = arith.constant 0 : index
    %39 = vector.load %arg11[%c0_34, %c128, %c0_35] : memref<2x144x112xbf16, #tpu.memory_space<vmem>>, vector<1x16x112xbf16>
    %40 = vector.shape_cast %39 : vector<1x16x112xbf16> to vector<16x112xbf16>
    %41 = vector.shape_cast %0 : vector<16x112xbf16> to vector<1x16x112xbf16>
    tpu.vector_store %arg11[%c0_34, %c128, %c0_35], %41 {strides = array<i32>} : memref<2x144x112xbf16, #tpu.memory_space<vmem>>, vector<1x16x112xbf16>,
    %c1_36 = arith.constant 1 : index
    %c0_37 = arith.constant 0 : index
    %c0_38 = arith.constant 0 : index
    %42 = vector.load %arg11[%c1_36, %c0_37, %c0_38] : memref<2x144x112xbf16, #tpu.memory_space<vmem>>, vector<1x16x112xbf16>
    %43 = vector.shape_cast %42 : vector<1x16x112xbf16> to vector<16x112xbf16>
    %44 = vector.shape_cast %0 : vector<16x112xbf16> to vector<1x16x112xbf16>
    tpu.vector_store %arg11[%c1_36, %c0_37, %c0_38], %44 {strides = array<i32>} : memref<2x144x112xbf16, #tpu.memory_space<vmem>>, vector<1x16x112xbf16>,
    %c1_39 = arith.constant 1 : index
    %c128_40 = arith.constant 128 : index
    %c0_41 = arith.constant 0 : index
    %45 = vector.load %arg11[%c1_39, %c128_40, %c0_41] : memref<2x144x112xbf16, #tpu.memory_space<vmem>>, vector<1x16x112xbf16>
    %46 = vector.shape_cast %45 : vector<1x16x112xbf16> to vector<16x112xbf16>
    %47 = vector.shape_cast %0 : vector<16x112xbf16> to vector<1x16x112xbf16>
    tpu.vector_store %arg11[%c1_39, %c128_40, %c0_41], %47 {strides = array<i32>} : memref<2x144x112xbf16, #tpu.memory_space<vmem>>, vector<1x16x112xbf16>,
    %48 = vector.extract_strided_slice %35 {offsets = [0, 0], sizes = [16, 112], strides = [1, 1]} : vector<224x112xbf16> to vector<16x112xbf16>
    %c0_42 = arith.constant 0 : index
    %c16_43 = arith.constant 16 : index
    %c0_44 = arith.constant 0 : index
    %49 = vector.load %arg11[%c0_42, %c16_43, %c0_44] : memref<2x144x112xbf16, #tpu.memory_space<vmem>>, vector<1x16x112xbf16>
    %50 = vector.shape_cast %49 : vector<1x16x112xbf16> to vector<16x112xbf16>
    %51 = vector.shape_cast %48 : vector<16x112xbf16> to vector<1x16x112xbf16>
    tpu.vector_store %arg11[%c0_42, %c16_43, %c0_44], %51 {strides = array<i32>} : memref<2x144x112xbf16, #tpu.memory_space<vmem>>, vector<1x16x112xbf16>,
    %52 = vector.extract_strided_slice %35 {offsets = [16, 0], sizes = [16, 112], strides = [1, 1]} : vector<224x112xbf16> to vector<16x112xbf16>
    %c1_45 = arith.constant 1 : index
    %c16_46 = arith.constant 16 : index
    %c0_47 = arith.constant 0 : index
    %53 = vector.load %arg11[%c1_45, %c16_46, %c0_47] : memref<2x144x112xbf16, #tpu.memory_space<vmem>>, vector<1x16x112xbf16>
    %54 = vector.shape_cast %53 : vector<1x16x112xbf16> to vector<16x112xbf16>
    %55 = vector.shape_cast %52 : vector<16x112xbf16> to vector<1x16x112xbf16>
    tpu.vector_store %arg11[%c1_45, %c16_46, %c0_47], %55 {strides = array<i32>} : memref<2x144x112xbf16, #tpu.memory_space<vmem>>, vector<1x16x112xbf16>,
    %56 = vector.extract_strided_slice %35 {offsets = [32, 0], sizes = [16, 112], strides = [1, 1]} : vector<224x112xbf16> to vector<16x112xbf16>
    %c0_48 = arith.constant 0 : index
    %c32_49 = arith.constant 32 : index
    %c0_50 = arith.constant 0 : index
    %57 = vector.load %arg11[%c0_48, %c32_49, %c0_50] : memref<2x144x112xbf16, #tpu.memory_space<vmem>>, vector<1x16x112xbf16>
    %58 = vector.shape_cast %57 : vector<1x16x112xbf16> to vector<16x112xbf16>
    %59 = vector.shape_cast %56 : vector<16x112xbf16> to vector<1x16x112xbf16>
    tpu.vector_store %arg11[%c0_48, %c32_49, %c0_50], %59 {strides = array<i32>} : memref<2x144x112xbf16, #tpu.memory_space<vmem>>, vector<1x16x112xbf16>,
    %60 = vector.extract_strided_slice %35 {offsets = [48, 0], sizes = [16, 112], strides = [1, 1]} : vector<224x112xbf16> to vector<16x112xbf16>
    %c1_51 = arith.constant 1 : index
    %c32_52 = arith.constant 32 : index
    %c0_53 = arith.constant 0 : index
    %61 = vector.load %arg11[%c1_51, %c32_52, %c0_53] : memref<2x144x112xbf16, #tpu.memory_space<vmem>>, vector<1x16x112xbf16>
    %62 = vector.shape_cast %61 : vector<1x16x112xbf16> to vector<16x112xbf16>
    %63 = vector.shape_cast %60 : vector<16x112xbf16> to vector<1x16x112xbf16>
    tpu.vector_store %arg11[%c1_51, %c32_52, %c0_53], %63 {strides = array<i32>} : memref<2x144x112xbf16, #tpu.memory_space<vmem>>, vector<1x16x112xbf16>,
    %64 = vector.extract_strided_slice %35 {offsets = [64, 0], sizes = [16, 112], strides = [1, 1]} : vector<224x112xbf16> to vector<16x112xbf16>
    %c0_54 = arith.constant 0 : index
    %c48 = arith.constant 48 : index
    %c0_55 = arith.constant 0 : index
    %65 = vector.load %arg11[%c0_54, %c48, %c0_55] : memref<2x144x112xbf16, #tpu.memory_space<vmem>>, vector<1x16x112xbf16>
    %66 = vector.shape_cast %65 : vector<1x16x112xbf16> to vector<16x112xbf16>
    %67 = vector.shape_cast %64 : vector<16x112xbf16> to vector<1x16x112xbf16>
    tpu.vector_store %arg11[%c0_54, %c48, %c0_55], %67 {strides = array<i32>} : memref<2x144x112xbf16, #tpu.memory_space<vmem>>, vector<1x16x112xbf16>,
    %68 = vector.extract_strided_slice %35 {offsets = [80, 0], sizes = [16, 112], strides = [1, 1]} : vector<224x112xbf16> to vector<16x112xbf16>
    %c1_56 = arith.constant 1 : index
    %c48_57 = arith.constant 48 : index
    %c0_58 = arith.constant 0 : index
    %69 = vector.load %arg11[%c1_56, %c48_57, %c0_58] : memref<2x144x112xbf16, #tpu.memory_space<vmem>>, vector<1x16x112xbf16>
    %70 = vector.shape_cast %69 : vector<1x16x112xbf16> to vector<16x112xbf16>
    %71 = vector.shape_cast %68 : vector<16x112xbf16> to vector<1x16x112xbf16>
    tpu.vector_store %arg11[%c1_56, %c48_57, %c0_58], %71 {strides = array<i32>} : memref<2x144x112xbf16, #tpu.memory_space<vmem>>, vector<1x16x112xbf16>,
    %72 = vector.extract_strided_slice %35 {offsets = [96, 0], sizes = [16, 112], strides = [1, 1]} : vector<224x112xbf16> to vector<16x112xbf16>
    %c0_59 = arith.constant 0 : index
    %c64 = arith.constant 64 : index
    %c0_60 = arith.constant 0 : index
    %73 = vector.load %arg11[%c0_59, %c64, %c0_60] : memref<2x144x112xbf16, #tpu.memory_space<vmem>>, vector<1x16x112xbf16>
    %74 = vector.shape_cast %73 : vector<1x16x112xbf16> to vector<16x112xbf16>
    %75 = vector.shape_cast %72 : vector<16x112xbf16> to vector<1x16x112xbf16>
    tpu.vector_store %arg11[%c0_59, %c64, %c0_60], %75 {strides = array<i32>} : memref<2x144x112xbf16, #tpu.memory_space<vmem>>, vector<1x16x112xbf16>,
    %76 = vector.extract_strided_slice %35 {offsets = [112, 0], sizes = [16, 112], strides = [1, 1]} : vector<224x112xbf16> to vector<16x112xbf16>
    %c1_61 = arith.constant 1 : index
    %c64_62 = arith.constant 64 : index
    %c0_63 = arith.constant 0 : index
    %77 = vector.load %arg11[%c1_61, %c64_62, %c0_63] : memref<2x144x112xbf16, #tpu.memory_space<vmem>>, vector<1x16x112xbf16>
    %78 = vector.shape_cast %77 : vector<1x16x112xbf16> to vector<16x112xbf16>
    %79 = vector.shape_cast %76 : vector<16x112xbf16> to vector<1x16x112xbf16>
    tpu.vector_store %arg11[%c1_61, %c64_62, %c0_63], %79 {strides = array<i32>} : memref<2x144x112xbf16, #tpu.memory_space<vmem>>, vector<1x16x112xbf16>,
    %80 = vector.extract_strided_slice %35 {offsets = [128, 0], sizes = [16, 112], strides = [1, 1]} : vector<224x112xbf16> to vector<16x112xbf16>
    %c0_64 = arith.constant 0 : index
    %c80 = arith.constant 80 : index
    %c0_65 = arith.constant 0 : index
    %81 = vector.load %arg11[%c0_64, %c80, %c0_65] : memref<2x144x112xbf16, #tpu.memory_space<vmem>>, vector<1x16x112xbf16>
    %82 = vector.shape_cast %81 : vector<1x16x112xbf16> to vector<16x112xbf16>
    %83 = vector.shape_cast %80 : vector<16x112xbf16> to vector<1x16x112xbf16>
    tpu.vector_store %arg11[%c0_64, %c80, %c0_65], %83 {strides = array<i32>} : memref<2x144x112xbf16, #tpu.memory_space<vmem>>, vector<1x16x112xbf16>,
    %84 = vector.extract_strided_slice %35 {offsets = [144, 0], sizes = [16, 112], strides = [1, 1]} : vector<224x112xbf16> to vector<16x112xbf16>
    %c1_66 = arith.constant 1 : index
    %c80_67 = arith.constant 80 : index
    %c0_68 = arith.constant 0 : index
    %85 = vector.load %arg11[%c1_66, %c80_67, %c0_68] : memref<2x144x112xbf16, #tpu.memory_space<vmem>>, vector<1x16x112xbf16>
    %86 = vector.shape_cast %85 : vector<1x16x112xbf16> to vector<16x112xbf16>
    %87 = vector.shape_cast %84 : vector<16x112xbf16> to vector<1x16x112xbf16>
    tpu.vector_store %arg11[%c1_66, %c80_67, %c0_68], %87 {strides = array<i32>} : memref<2x144x112xbf16, #tpu.memory_space<vmem>>, vector<1x16x112xbf16>,
    %88 = vector.extract_strided_slice %35 {offsets = [160, 0], sizes = [16, 112], strides = [1, 1]} : vector<224x112xbf16> to vector<16x112xbf16>
    %c0_69 = arith.constant 0 : index
    %c96 = arith.constant 96 : index
    %c0_70 = arith.constant 0 : index
    %89 = vector.load %arg11[%c0_69, %c96, %c0_70] : memref<2x144x112xbf16, #tpu.memory_space<vmem>>, vector<1x16x112xbf16>
    %90 = vector.shape_cast %89 : vector<1x16x112xbf16> to vector<16x112xbf16>
    %91 = vector.shape_cast %88 : vector<16x112xbf16> to vector<1x16x112xbf16>
    tpu.vector_store %arg11[%c0_69, %c96, %c0_70], %91 {strides = array<i32>} : memref<2x144x112xbf16, #tpu.memory_space<vmem>>, vector<1x16x112xbf16>,
    %92 = vector.extract_strided_slice %35 {offsets = [176, 0], sizes = [16, 112], strides = [1, 1]} : vector<224x112xbf16> to vector<16x112xbf16>
    %c1_71 = arith.constant 1 : index
    %c96_72 = arith.constant 96 : index
    %c0_73 = arith.constant 0 : index
    %93 = vector.load %arg11[%c1_71, %c96_72, %c0_73] : memref<2x144x112xbf16, #tpu.memory_space<vmem>>, vector<1x16x112xbf16>
    %94 = vector.shape_cast %93 : vector<1x16x112xbf16> to vector<16x112xbf16>
    %95 = vector.shape_cast %92 : vector<16x112xbf16> to vector<1x16x112xbf16>
    tpu.vector_store %arg11[%c1_71, %c96_72, %c0_73], %95 {strides = array<i32>} : memref<2x144x112xbf16, #tpu.memory_space<vmem>>, vector<1x16x112xbf16>,
    %96 = vector.extract_strided_slice %35 {offsets = [192, 0], sizes = [16, 112], strides = [1, 1]} : vector<224x112xbf16> to vector<16x112xbf16>
    %c0_74 = arith.constant 0 : index
    %c112 = arith.constant 112 : index
    %c0_75 = arith.constant 0 : index
    %97 = vector.load %arg11[%c0_74, %c112, %c0_75] : memref<2x144x112xbf16, #tpu.memory_space<vmem>>, vector<1x16x112xbf16>
    %98 = vector.shape_cast %97 : vector<1x16x112xbf16> to vector<16x112xbf16>
    %99 = vector.shape_cast %96 : vector<16x112xbf16> to vector<1x16x112xbf16>
    tpu.vector_store %arg11[%c0_74, %c112, %c0_75], %99 {strides = array<i32>} : memref<2x144x112xbf16, #tpu.memory_space<vmem>>, vector<1x16x112xbf16>,
    %100 = vector.extract_strided_slice %35 {offsets = [208, 0], sizes = [16, 112], strides = [1, 1]} : vector<224x112xbf16> to vector<16x112xbf16>
    %c1_76 = arith.constant 1 : index
    %c112_77 = arith.constant 112 : index
    %c0_78 = arith.constant 0 : index
    %101 = vector.load %arg11[%c1_76, %c112_77, %c0_78] : memref<2x144x112xbf16, #tpu.memory_space<vmem>>, vector<1x16x112xbf16>
    %102 = vector.shape_cast %101 : vector<1x16x112xbf16> to vector<16x112xbf16>
    %103 = vector.shape_cast %100 : vector<16x112xbf16> to vector<1x16x112xbf16>
    tpu.vector_store %arg11[%c1_76, %c112_77, %c0_78], %103 {strides = array<i32>} : memref<2x144x112xbf16, #tpu.memory_space<vmem>>, vector<1x16x112xbf16>,
    %c0_79 = arith.constant 0 : index
    %c0_80 = arith.constant 0 : index
    %c0_81 = arith.constant 0 : index
    %104 = vector.load %arg11[%c0_79, %c0_80, %c0_81] : memref<2x144x112xbf16, #tpu.memory_space<vmem>>, vector<1x112x112xbf16>
    %105 = vector.shape_cast %104 : vector<1x112x112xbf16> to vector<112x112xbf16>
    %c0_82 = arith.constant 0 : index
    %c0_83 = arith.constant 0 : index
    %c0_84 = arith.constant 0 : index
    %106 = vector.load %arg4[%c0_82, %c0_83, %c0_84] : memref<5x112x112xbf16, #tpu.memory_space<vmem>>, vector<1x112x112xbf16>
    %107 = vector.shape_cast %106 : vector<1x112x112xbf16> to vector<112x112xbf16>
    %cst_85 = arith.constant dense<0.000000e+00> : vector<112x112xf32>
    %108 = tpu.matmul %105, %107, %cst_85 {dimension_numbers = #tpu.dot_dimension_numbers<[1], [0], [0], [1], [0, 0, 1, 1], [], []>} : vector<112x112xbf16>, vector<112x112xbf16>, vector<112x112xf32> -> vector<112x112xf32>
    %c1_86 = arith.constant 1 : index
    %c0_87 = arith.constant 0 : index
    %c0_88 = arith.constant 0 : index
    %109 = vector.load %arg11[%c1_86, %c0_87, %c0_88] : memref<2x144x112xbf16, #tpu.memory_space<vmem>>, vector<1x112x112xbf16>
    %110 = vector.shape_cast %109 : vector<1x112x112xbf16> to vector<112x112xbf16>
    %c1_89 = arith.constant 1 : index
    %c0_90 = arith.constant 0 : index
    %c0_91 = arith.constant 0 : index
    %111 = vector.load %arg4[%c1_89, %c0_90, %c0_91] : memref<5x112x112xbf16, #tpu.memory_space<vmem>>, vector<1x112x112xbf16>
    %112 = vector.shape_cast %111 : vector<1x112x112xbf16> to vector<112x112xbf16>
    %cst_92 = arith.constant dense<0.000000e+00> : vector<112x112xf32>
    %113 = tpu.matmul %110, %112, %cst_92 {dimension_numbers = #tpu.dot_dimension_numbers<[1], [0], [0], [1], [0, 0, 1, 1], [], []>} : vector<112x112xbf16>, vector<112x112xbf16>, vector<112x112xf32> -> vector<112x112xf32>
    %114 = arith.addf %108, %113 : vector<112x112xf32>
    %c0_93 = arith.constant 0 : index
    %c16_94 = arith.constant 16 : index
    %c0_95 = arith.constant 0 : index
    %115 = vector.load %arg11[%c0_93, %c16_94, %c0_95] : memref<2x144x112xbf16, #tpu.memory_space<vmem>>, vector<1x112x112xbf16>
    %116 = vector.shape_cast %115 : vector<1x112x112xbf16> to vector<112x112xbf16>
    %c2_96 = arith.constant 2 : index
    %c0_97 = arith.constant 0 : index
    %c0_98 = arith.constant 0 : index
    %117 = vector.load %arg4[%c2_96, %c0_97, %c0_98] : memref<5x112x112xbf16, #tpu.memory_space<vmem>>, vector<1x112x112xbf16>
    %118 = vector.shape_cast %117 : vector<1x112x112xbf16> to vector<112x112xbf16>
    %cst_99 = arith.constant dense<0.000000e+00> : vector<112x112xf32>
    %119 = tpu.matmul %116, %118, %cst_99 {dimension_numbers = #tpu.dot_dimension_numbers<[1], [0], [0], [1], [0, 0, 1, 1], [], []>} : vector<112x112xbf16>, vector<112x112xbf16>, vector<112x112xf32> -> vector<112x112xf32>
    %120 = arith.addf %114, %119 : vector<112x112xf32>
    %c1_100 = arith.constant 1 : index
    %c16_101 = arith.constant 16 : index
    %c0_102 = arith.constant 0 : index
    %121 = vector.load %arg11[%c1_100, %c16_101, %c0_102] : memref<2x144x112xbf16, #tpu.memory_space<vmem>>, vector<1x112x112xbf16>
    %122 = vector.shape_cast %121 : vector<1x112x112xbf16> to vector<112x112xbf16>
    %c3_103 = arith.constant 3 : index
    %c0_104 = arith.constant 0 : index
    %c0_105 = arith.constant 0 : index
    %123 = vector.load %arg4[%c3_103, %c0_104, %c0_105] : memref<5x112x112xbf16, #tpu.memory_space<vmem>>, vector<1x112x112xbf16>
    %124 = vector.shape_cast %123 : vector<1x112x112xbf16> to vector<112x112xbf16>
    %cst_106 = arith.constant dense<0.000000e+00> : vector<112x112xf32>
    %125 = tpu.matmul %122, %124, %cst_106 {dimension_numbers = #tpu.dot_dimension_numbers<[1], [0], [0], [1], [0, 0, 1, 1], [], []>} : vector<112x112xbf16>, vector<112x112xbf16>, vector<112x112xf32> -> vector<112x112xf32>
    %126 = arith.addf %120, %125 : vector<112x112xf32>
    %c0_107 = arith.constant 0 : index
    %c32_108 = arith.constant 32 : index
    %c0_109 = arith.constant 0 : index
    %127 = vector.load %arg11[%c0_107, %c32_108, %c0_109] : memref<2x144x112xbf16, #tpu.memory_space<vmem>>, vector<1x112x112xbf16>
    %128 = vector.shape_cast %127 : vector<1x112x112xbf16> to vector<112x112xbf16>
    %c4_110 = arith.constant 4 : index
    %c0_111 = arith.constant 0 : index
    %c0_112 = arith.constant 0 : index
    %129 = vector.load %arg4[%c4_110, %c0_111, %c0_112] : memref<5x112x112xbf16, #tpu.memory_space<vmem>>, vector<1x112x112xbf16>
    %130 = vector.shape_cast %129 : vector<1x112x112xbf16> to vector<112x112xbf16>
    %cst_113 = arith.constant dense<0.000000e+00> : vector<112x112xf32>
    %131 = tpu.matmul %128, %130, %cst_113 {dimension_numbers = #tpu.dot_dimension_numbers<[1], [0], [0], [1], [0, 0, 1, 1], [], []>} : vector<112x112xbf16>, vector<112x112xbf16>, vector<112x112xf32> -> vector<112x112xf32>
    %132 = arith.addf %126, %131 : vector<112x112xf32>
    %c0_114 = arith.constant 0 : index
    %c0_115 = arith.constant 0 : index
    %133 = vector.load %arg5[%c0_114, %c0_115] : memref<1x112xf32, #tpu.memory_space<vmem>>, vector<1x112xf32>
    %134 = vector.broadcast %133 : vector<1x112xf32> to vector<112x112xf32>
    %135 = arith.addf %132, %134 : vector<112x112xf32>
    %cst_116 = arith.constant 0.000000e+00 : f32
    %136 = vector.broadcast %cst_116 : f32 to vector<112x112xf32>
    %137 = arith.maximumf %135, %136 : vector<112x112xf32>
    %138 = arith.truncf %137 : vector<112x112xf32> to vector<112x112xbf16>
    %c0_117 = arith.constant 0 : index
    %c0_118 = arith.constant 0 : index
    %c0_119 = arith.constant 0 : index
    %139 = vector.load %arg12[%c0_117, %c0_118, %c0_119] : memref<2x96x112xbf16, #tpu.memory_space<vmem>>, vector<1x16x112xbf16>
    %140 = vector.shape_cast %139 : vector<1x16x112xbf16> to vector<16x112xbf16>
    %141 = vector.shape_cast %0 : vector<16x112xbf16> to vector<1x16x112xbf16>
    tpu.vector_store %arg12[%c0_117, %c0_118, %c0_119], %141 {strides = array<i32>} : memref<2x96x112xbf16, #tpu.memory_space<vmem>>, vector<1x16x112xbf16>,
    %c0_120 = arith.constant 0 : index
    %c80_121 = arith.constant 80 : index
    %c0_122 = arith.constant 0 : index
    %142 = vector.load %arg12[%c0_120, %c80_121, %c0_122] : memref<2x96x112xbf16, #tpu.memory_space<vmem>>, vector<1x16x112xbf16>
    %143 = vector.shape_cast %142 : vector<1x16x112xbf16> to vector<16x112xbf16>
    %144 = vector.shape_cast %0 : vector<16x112xbf16> to vector<1x16x112xbf16>
    tpu.vector_store %arg12[%c0_120, %c80_121, %c0_122], %144 {strides = array<i32>} : memref<2x96x112xbf16, #tpu.memory_space<vmem>>, vector<1x16x112xbf16>,
    %c1_123 = arith.constant 1 : index
    %c0_124 = arith.constant 0 : index
    %c0_125 = arith.constant 0 : index
    %145 = vector.load %arg12[%c1_123, %c0_124, %c0_125] : memref<2x96x112xbf16, #tpu.memory_space<vmem>>, vector<1x16x112xbf16>
    %146 = vector.shape_cast %145 : vector<1x16x112xbf16> to vector<16x112xbf16>
    %147 = vector.shape_cast %0 : vector<16x112xbf16> to vector<1x16x112xbf16>
    tpu.vector_store %arg12[%c1_123, %c0_124, %c0_125], %147 {strides = array<i32>} : memref<2x96x112xbf16, #tpu.memory_space<vmem>>, vector<1x16x112xbf16>,
    %c1_126 = arith.constant 1 : index
    %c64_127 = arith.constant 64 : index
    %c0_128 = arith.constant 0 : index
    %148 = vector.load %arg12[%c1_126, %c64_127, %c0_128] : memref<2x96x112xbf16, #tpu.memory_space<vmem>>, vector<1x16x112xbf16>
    %149 = vector.shape_cast %148 : vector<1x16x112xbf16> to vector<16x112xbf16>
    %150 = vector.shape_cast %0 : vector<16x112xbf16> to vector<1x16x112xbf16>
    tpu.vector_store %arg12[%c1_126, %c64_127, %c0_128], %150 {strides = array<i32>} : memref<2x96x112xbf16, #tpu.memory_space<vmem>>, vector<1x16x112xbf16>,
    %151 = vector.extract_strided_slice %138 {offsets = [0, 0], sizes = [16, 112], strides = [1, 1]} : vector<112x112xbf16> to vector<16x112xbf16>
    %c0_129 = arith.constant 0 : index
    %c16_130 = arith.constant 16 : index
    %c0_131 = arith.constant 0 : index
    %152 = vector.load %arg12[%c0_129, %c16_130, %c0_131] : memref<2x96x112xbf16, #tpu.memory_space<vmem>>, vector<1x16x112xbf16>
    %153 = vector.shape_cast %152 : vector<1x16x112xbf16> to vector<16x112xbf16>
    %154 = vector.shape_cast %151 : vector<16x112xbf16> to vector<1x16x112xbf16>
    tpu.vector_store %arg12[%c0_129, %c16_130, %c0_131], %154 {strides = array<i32>} : memref<2x96x112xbf16, #tpu.memory_space<vmem>>, vector<1x16x112xbf16>,
    %155 = vector.extract_strided_slice %138 {offsets = [16, 0], sizes = [16, 112], strides = [1, 1]} : vector<112x112xbf16> to vector<16x112xbf16>
    %c1_132 = arith.constant 1 : index
    %c16_133 = arith.constant 16 : index
    %c0_134 = arith.constant 0 : index
    %156 = vector.load %arg12[%c1_132, %c16_133, %c0_134] : memref<2x96x112xbf16, #tpu.memory_space<vmem>>, vector<1x16x112xbf16>
    %157 = vector.shape_cast %156 : vector<1x16x112xbf16> to vector<16x112xbf16>
    %158 = vector.shape_cast %155 : vector<16x112xbf16> to vector<1x16x112xbf16>
    tpu.vector_store %arg12[%c1_132, %c16_133, %c0_134], %158 {strides = array<i32>} : memref<2x96x112xbf16, #tpu.memory_space<vmem>>, vector<1x16x112xbf16>,
    %159 = vector.extract_strided_slice %138 {offsets = [32, 0], sizes = [16, 112], strides = [1, 1]} : vector<112x112xbf16> to vector<16x112xbf16>
    %c0_135 = arith.constant 0 : index
    %c32_136 = arith.constant 32 : index
    %c0_137 = arith.constant 0 : index
    %160 = vector.load %arg12[%c0_135, %c32_136, %c0_137] : memref<2x96x112xbf16, #tpu.memory_space<vmem>>, vector<1x16x112xbf16>
    %161 = vector.shape_cast %160 : vector<1x16x112xbf16> to vector<16x112xbf16>
    %162 = vector.shape_cast %159 : vector<16x112xbf16> to vector<1x16x112xbf16>
    tpu.vector_store %arg12[%c0_135, %c32_136, %c0_137], %162 {strides = array<i32>} : memref<2x96x112xbf16, #tpu.memory_space<vmem>>, vector<1x16x112xbf16>,
    %163 = vector.extract_strided_slice %138 {offsets = [48, 0], sizes = [16, 112], strides = [1, 1]} : vector<112x112xbf16> to vector<16x112xbf16>
    %c1_138 = arith.constant 1 : index
    %c32_139 = arith.constant 32 : index
    %c0_140 = arith.constant 0 : index
    %164 = vector.load %arg12[%c1_138, %c32_139, %c0_140] : memref<2x96x112xbf16, #tpu.memory_space<vmem>>, vector<1x16x112xbf16>
    %165 = vector.shape_cast %164 : vector<1x16x112xbf16> to vector<16x112xbf16>
    %166 = vector.shape_cast %163 : vector<16x112xbf16> to vector<1x16x112xbf16>
    tpu.vector_store %arg12[%c1_138, %c32_139, %c0_140], %166 {strides = array<i32>} : memref<2x96x112xbf16, #tpu.memory_space<vmem>>, vector<1x16x112xbf16>,
    %167 = vector.extract_strided_slice %138 {offsets = [64, 0], sizes = [16, 112], strides = [1, 1]} : vector<112x112xbf16> to vector<16x112xbf16>
    %c0_141 = arith.constant 0 : index
    %c48_142 = arith.constant 48 : index
    %c0_143 = arith.constant 0 : index
    %168 = vector.load %arg12[%c0_141, %c48_142, %c0_143] : memref<2x96x112xbf16, #tpu.memory_space<vmem>>, vector<1x16x112xbf16>
    %169 = vector.shape_cast %168 : vector<1x16x112xbf16> to vector<16x112xbf16>
    %170 = vector.shape_cast %167 : vector<16x112xbf16> to vector<1x16x112xbf16>
    tpu.vector_store %arg12[%c0_141, %c48_142, %c0_143], %170 {strides = array<i32>} : memref<2x96x112xbf16, #tpu.memory_space<vmem>>, vector<1x16x112xbf16>,
    %171 = vector.extract_strided_slice %138 {offsets = [80, 0], sizes = [16, 112], strides = [1, 1]} : vector<112x112xbf16> to vector<16x112xbf16>
    %c1_144 = arith.constant 1 : index
    %c48_145 = arith.constant 48 : index
    %c0_146 = arith.constant 0 : index
    %172 = vector.load %arg12[%c1_144, %c48_145, %c0_146] : memref<2x96x112xbf16, #tpu.memory_space<vmem>>, vector<1x16x112xbf16>
    %173 = vector.shape_cast %172 : vector<1x16x112xbf16> to vector<16x112xbf16>
    %174 = vector.shape_cast %171 : vector<16x112xbf16> to vector<1x16x112xbf16>
    tpu.vector_store %arg12[%c1_144, %c48_145, %c0_146], %174 {strides = array<i32>} : memref<2x96x112xbf16, #tpu.memory_space<vmem>>, vector<1x16x112xbf16>,
    %175 = vector.extract_strided_slice %138 {offsets = [96, 0], sizes = [16, 112], strides = [1, 1]} : vector<112x112xbf16> to vector<16x112xbf16>
    %c0_147 = arith.constant 0 : index
    %c64_148 = arith.constant 64 : index
    %c0_149 = arith.constant 0 : index
    %176 = vector.load %arg12[%c0_147, %c64_148, %c0_149] : memref<2x96x112xbf16, #tpu.memory_space<vmem>>, vector<1x16x112xbf16>
    %177 = vector.shape_cast %176 : vector<1x16x112xbf16> to vector<16x112xbf16>
    %178 = vector.shape_cast %175 : vector<16x112xbf16> to vector<1x16x112xbf16>
    tpu.vector_store %arg12[%c0_147, %c64_148, %c0_149], %178 {strides = array<i32>} : memref<2x96x112xbf16, #tpu.memory_space<vmem>>, vector<1x16x112xbf16>,
    %c0_150 = arith.constant 0 : index
    %c0_151 = arith.constant 0 : index
    %c0_152 = arith.constant 0 : index
    %179 = vector.load %arg12[%c0_150, %c0_151, %c0_152] : memref<2x96x112xbf16, #tpu.memory_space<vmem>>, vector<1x64x112xbf16>
    %180 = vector.shape_cast %179 : vector<1x64x112xbf16> to vector<64x112xbf16>
    %c0_153 = arith.constant 0 : index
    %c0_154 = arith.constant 0 : index
    %c0_155 = arith.constant 0 : index
    %181 = vector.load %arg6[%c0_153, %c0_154, %c0_155] : memref<5x112x128xbf16, #tpu.memory_space<vmem>>, vector<1x112x128xbf16>
    %182 = vector.shape_cast %181 : vector<1x112x128xbf16> to vector<112x128xbf16>
    %cst_156 = arith.constant dense<0.000000e+00> : vector<64x128xf32>
    %183 = tpu.matmul %180, %182, %cst_156 {dimension_numbers = #tpu.dot_dimension_numbers<[1], [0], [0], [1], [0, 0, 1, 1], [], []>} : vector<64x112xbf16>, vector<112x128xbf16>, vector<64x128xf32> -> vector<64x128xf32>
    %c1_157 = arith.constant 1 : index
    %c0_158 = arith.constant 0 : index
    %c0_159 = arith.constant 0 : index
    %184 = vector.load %arg12[%c1_157, %c0_158, %c0_159] : memref<2x96x112xbf16, #tpu.memory_space<vmem>>, vector<1x64x112xbf16>
    %185 = vector.shape_cast %184 : vector<1x64x112xbf16> to vector<64x112xbf16>
    %c1_160 = arith.constant 1 : index
    %c0_161 = arith.constant 0 : index
    %c0_162 = arith.constant 0 : index
    %186 = vector.load %arg6[%c1_160, %c0_161, %c0_162] : memref<5x112x128xbf16, #tpu.memory_space<vmem>>, vector<1x112x128xbf16>
    %187 = vector.shape_cast %186 : vector<1x112x128xbf16> to vector<112x128xbf16>
    %cst_163 = arith.constant dense<0.000000e+00> : vector<64x128xf32>
    %188 = tpu.matmul %185, %187, %cst_163 {dimension_numbers = #tpu.dot_dimension_numbers<[1], [0], [0], [1], [0, 0, 1, 1], [], []>} : vector<64x112xbf16>, vector<112x128xbf16>, vector<64x128xf32> -> vector<64x128xf32>
    %189 = arith.addf %183, %188 : vector<64x128xf32>
    %c0_164 = arith.constant 0 : index
    %c16_165 = arith.constant 16 : index
    %c0_166 = arith.constant 0 : index
    %190 = vector.load %arg12[%c0_164, %c16_165, %c0_166] : memref<2x96x112xbf16, #tpu.memory_space<vmem>>, vector<1x64x112xbf16>
    %191 = vector.shape_cast %190 : vector<1x64x112xbf16> to vector<64x112xbf16>
    %c2_167 = arith.constant 2 : index
    %c0_168 = arith.constant 0 : index
    %c0_169 = arith.constant 0 : index
    %192 = vector.load %arg6[%c2_167, %c0_168, %c0_169] : memref<5x112x128xbf16, #tpu.memory_space<vmem>>, vector<1x112x128xbf16>
    %193 = vector.shape_cast %192 : vector<1x112x128xbf16> to vector<112x128xbf16>
    %cst_170 = arith.constant dense<0.000000e+00> : vector<64x128xf32>
    %194 = tpu.matmul %191, %193, %cst_170 {dimension_numbers = #tpu.dot_dimension_numbers<[1], [0], [0], [1], [0, 0, 1, 1], [], []>} : vector<64x112xbf16>, vector<112x128xbf16>, vector<64x128xf32> -> vector<64x128xf32>
    %195 = arith.addf %189, %194 : vector<64x128xf32>
    %c1_171 = arith.constant 1 : index
    %c16_172 = arith.constant 16 : index
    %c0_173 = arith.constant 0 : index
    %196 = vector.load %arg12[%c1_171, %c16_172, %c0_173] : memref<2x96x112xbf16, #tpu.memory_space<vmem>>, vector<1x64x112xbf16>
    %197 = vector.shape_cast %196 : vector<1x64x112xbf16> to vector<64x112xbf16>
    %c3_174 = arith.constant 3 : index
    %c0_175 = arith.constant 0 : index
    %c0_176 = arith.constant 0 : index
    %198 = vector.load %arg6[%c3_174, %c0_175, %c0_176] : memref<5x112x128xbf16, #tpu.memory_space<vmem>>, vector<1x112x128xbf16>
    %199 = vector.shape_cast %198 : vector<1x112x128xbf16> to vector<112x128xbf16>
    %cst_177 = arith.constant dense<0.000000e+00> : vector<64x128xf32>
    %200 = tpu.matmul %197, %199, %cst_177 {dimension_numbers = #tpu.dot_dimension_numbers<[1], [0], [0], [1], [0, 0, 1, 1], [], []>} : vector<64x112xbf16>, vector<112x128xbf16>, vector<64x128xf32> -> vector<64x128xf32>
    %201 = arith.addf %195, %200 : vector<64x128xf32>
    %c0_178 = arith.constant 0 : index
    %c32_179 = arith.constant 32 : index
    %c0_180 = arith.constant 0 : index
    %202 = vector.load %arg12[%c0_178, %c32_179, %c0_180] : memref<2x96x112xbf16, #tpu.memory_space<vmem>>, vector<1x64x112xbf16>
    %203 = vector.shape_cast %202 : vector<1x64x112xbf16> to vector<64x112xbf16>
    %c4_181 = arith.constant 4 : index
    %c0_182 = arith.constant 0 : index
    %c0_183 = arith.constant 0 : index
    %204 = vector.load %arg6[%c4_181, %c0_182, %c0_183] : memref<5x112x128xbf16, #tpu.memory_space<vmem>>, vector<1x112x128xbf16>
    %205 = vector.shape_cast %204 : vector<1x112x128xbf16> to vector<112x128xbf16>
    %cst_184 = arith.constant dense<0.000000e+00> : vector<64x128xf32>
    %206 = tpu.matmul %203, %205, %cst_184 {dimension_numbers = #tpu.dot_dimension_numbers<[1], [0], [0], [1], [0, 0, 1, 1], [], []>} : vector<64x112xbf16>, vector<112x128xbf16>, vector<64x128xf32> -> vector<64x128xf32>
    %207 = arith.addf %201, %206 : vector<64x128xf32>
    %c0_185 = arith.constant 0 : index
    %c0_186 = arith.constant 0 : index
    %208 = vector.load %arg7[%c0_185, %c0_186] : memref<1x128xf32, #tpu.memory_space<vmem>>, vector<1x128xf32>
    %209 = vector.broadcast %208 : vector<1x128xf32> to vector<64x128xf32>
    %210 = arith.addf %207, %209 : vector<64x128xf32>
    %cst_187 = arith.constant 0.000000e+00 : f32
    %211 = vector.broadcast %cst_187 : f32 to vector<64x128xf32>
    %212 = arith.maximumf %210, %211 : vector<64x128xf32>
    %213 = arith.truncf %212 : vector<64x128xf32> to vector<64x128xbf16>
    %214 = vector.extract_strided_slice %213 {offsets = [0, 0], sizes = [16, 128], strides = [1, 1]} : vector<64x128xbf16> to vector<16x128xbf16>
    %c0_188 = arith.constant 0 : index
    %c0_189 = arith.constant 0 : index
    %c0_190 = arith.constant 0 : index
    %215 = vector.load %arg8[%c0_188, %c0_189, %c0_190] : memref<4x128x8xbf16, #tpu.memory_space<vmem>>, vector<1x128x8xbf16>
    %216 = vector.shape_cast %215 : vector<1x128x8xbf16> to vector<128x8xbf16>
    %cst_191 = arith.constant dense<0.000000e+00> : vector<16x8xf32>
    %217 = tpu.matmul %214, %216, %cst_191 {dimension_numbers = #tpu.dot_dimension_numbers<[1], [0], [0], [1], [0, 0, 1, 1], [], []>} : vector<16x128xbf16>, vector<128x8xbf16>, vector<16x8xf32> -> vector<16x8xf32>
    %218 = vector.extract_strided_slice %213 {offsets = [16, 0], sizes = [16, 128], strides = [1, 1]} : vector<64x128xbf16> to vector<16x128xbf16>
    %c1_192 = arith.constant 1 : index
    %c0_193 = arith.constant 0 : index
    %c0_194 = arith.constant 0 : index
    %219 = vector.load %arg8[%c1_192, %c0_193, %c0_194] : memref<4x128x8xbf16, #tpu.memory_space<vmem>>, vector<1x128x8xbf16>
    %220 = vector.shape_cast %219 : vector<1x128x8xbf16> to vector<128x8xbf16>
    %cst_195 = arith.constant dense<0.000000e+00> : vector<16x8xf32>
    %221 = tpu.matmul %218, %220, %cst_195 {dimension_numbers = #tpu.dot_dimension_numbers<[1], [0], [0], [1], [0, 0, 1, 1], [], []>} : vector<16x128xbf16>, vector<128x8xbf16>, vector<16x8xf32> -> vector<16x8xf32>
    %222 = arith.addf %217, %221 : vector<16x8xf32>
    %223 = vector.extract_strided_slice %213 {offsets = [32, 0], sizes = [16, 128], strides = [1, 1]} : vector<64x128xbf16> to vector<16x128xbf16>
    %c2_196 = arith.constant 2 : index
    %c0_197 = arith.constant 0 : index
    %c0_198 = arith.constant 0 : index
    %224 = vector.load %arg8[%c2_196, %c0_197, %c0_198] : memref<4x128x8xbf16, #tpu.memory_space<vmem>>, vector<1x128x8xbf16>
    %225 = vector.shape_cast %224 : vector<1x128x8xbf16> to vector<128x8xbf16>
    %cst_199 = arith.constant dense<0.000000e+00> : vector<16x8xf32>
    %226 = tpu.matmul %223, %225, %cst_199 {dimension_numbers = #tpu.dot_dimension_numbers<[1], [0], [0], [1], [0, 0, 1, 1], [], []>} : vector<16x128xbf16>, vector<128x8xbf16>, vector<16x8xf32> -> vector<16x8xf32>
    %227 = arith.addf %222, %226 : vector<16x8xf32>
    %228 = vector.extract_strided_slice %213 {offsets = [48, 0], sizes = [16, 128], strides = [1, 1]} : vector<64x128xbf16> to vector<16x128xbf16>
    %c3_200 = arith.constant 3 : index
    %c0_201 = arith.constant 0 : index
    %c0_202 = arith.constant 0 : index
    %229 = vector.load %arg8[%c3_200, %c0_201, %c0_202] : memref<4x128x8xbf16, #tpu.memory_space<vmem>>, vector<1x128x8xbf16>
    %230 = vector.shape_cast %229 : vector<1x128x8xbf16> to vector<128x8xbf16>
    %cst_203 = arith.constant dense<0.000000e+00> : vector<16x8xf32>
    %231 = tpu.matmul %228, %230, %cst_203 {dimension_numbers = #tpu.dot_dimension_numbers<[1], [0], [0], [1], [0, 0, 1, 1], [], []>} : vector<16x128xbf16>, vector<128x8xbf16>, vector<16x8xf32> -> vector<16x8xf32>
    %232 = arith.addf %227, %231 : vector<16x8xf32>
    %c0_204 = arith.constant 0 : index
    %c0_205 = arith.constant 0 : index
    %233 = vector.load %arg9[%c0_204, %c0_205] : memref<1x8xf32, #tpu.memory_space<vmem>>, vector<1x8xf32>
    %234 = vector.broadcast %233 : vector<1x8xf32> to vector<16x8xf32>
    %235 = arith.addf %232, %234 : vector<16x8xf32>
    %c0_206 = arith.constant 0 : index
    %c0_207 = arith.constant 0 : index
    %236 = vector.load %arg10[%c0_206, %c0_207] : memref<16x8xf32, #tpu.memory_space<vmem>>, vector<16x8xf32>
    tpu.vector_store %arg10[%c0_206, %c0_207], %235 {strides = array<i32>} : memref<16x8xf32, #tpu.memory_space<vmem>>, vector<16x8xf32>,
    return
  }
  func.func @transform_0(%arg0: i32) -> (i32, i32, i32) {
    %c0_i32 = arith.constant 0 : i32
    %c0_i32_0 = arith.constant 0 : i32
    %c0_i32_1 = arith.constant 0 : i32
    return %arg0, %c0_i32, %c0_i32_0 : i32, i32, i32
  }
  func.func @transform_1(%arg0: i32) -> (i32, i32, i32) {
    %c0_i32 = arith.constant 0 : i32
    %c0_i32_0 = arith.constant 0 : i32
    %c0_i32_1 = arith.constant 0 : i32
    %c0_i32_2 = arith.constant 0 : i32
    return %c0_i32, %c0_i32_0, %c0_i32_1 : i32, i32, i32
  }
  func.func @transform_2(%arg0: i32) -> (i32, i32) {
    %c0_i32 = arith.constant 0 : i32
    %c0_i32_0 = arith.constant 0 : i32
    %c0_i32_1 = arith.constant 0 : i32
    return %c0_i32, %c0_i32_0 : i32, i32
  }
  func.func @transform_3(%arg0: i32) -> (i32, i32, i32) {
    %c0_i32 = arith.constant 0 : i32
    %c0_i32_0 = arith.constant 0 : i32
    %c0_i32_1 = arith.constant 0 : i32
    %c0_i32_2 = arith.constant 0 : i32
    return %c0_i32, %c0_i32_0, %c0_i32_1 : i32, i32, i32
  }
  func.func @transform_4(%arg0: i32) -> (i32, i32) {
    %c0_i32 = arith.constant 0 : i32
    %c0_i32_0 = arith.constant 0 : i32
    %c0_i32_1 = arith.constant 0 : i32
    return %c0_i32, %c0_i32_0 : i32, i32
  }
  func.func @transform_5(%arg0: i32) -> (i32, i32, i32) {
    %c0_i32 = arith.constant 0 : i32
    %c0_i32_0 = arith.constant 0 : i32
    %c0_i32_1 = arith.constant 0 : i32
    %c0_i32_2 = arith.constant 0 : i32
    return %c0_i32, %c0_i32_0, %c0_i32_1 : i32, i32, i32
  }
  func.func @transform_6(%arg0: i32) -> (i32, i32) {
    %c0_i32 = arith.constant 0 : i32
    %c0_i32_0 = arith.constant 0 : i32
    %c0_i32_1 = arith.constant 0 : i32
    return %c0_i32, %c0_i32_0 : i32, i32
  }
  func.func @transform_7(%arg0: i32) -> (i32, i32, i32) {
    %c0_i32 = arith.constant 0 : i32
    %c0_i32_0 = arith.constant 0 : i32
    %c0_i32_1 = arith.constant 0 : i32
    %c0_i32_2 = arith.constant 0 : i32
    return %c0_i32, %c0_i32_0, %c0_i32_1 : i32, i32, i32
  }
  func.func @transform_8(%arg0: i32) -> (i32, i32) {
    %c0_i32 = arith.constant 0 : i32
    %c0_i32_0 = arith.constant 0 : i32
    %c0_i32_1 = arith.constant 0 : i32
    return %c0_i32, %c0_i32_0 : i32, i32
  }
  func.func @transform_9(%arg0: i32) -> (i32, i32) {
    %c0_i32 = arith.constant 0 : i32
    %c0_i32_0 = arith.constant 0 : i32
    return %arg0, %c0_i32 : i32, i32
  }
}

</mosaic_0001>

<bundles_post_ra>
// kernel: mnist_encoder_forward.1
= control target key start
LH: loop header
LB: loop body
LE: loop exit
PB: predicated region body
PF: predicated region fallthrough
CT: control target
= control target key end

     0   :  { %vm223_vm0 = vcmask 1045504   ;;  %vm180_vm1 = vcmask 228352   ;;  %v5562_v52 = vmov 0.0   ;;  %vm1716_vm2 = vcmask 916480   ;;  %s6656_s1 = inlined_call_operand.vmem [shape: bf16[5,28,112], index: 1, kind: input, shape index: {}]   ;;  %s6657_s0 = inlined_call_operand.vmem [shape: bf16[2,256,28], index: 0, kind: input, shape index: {}]   ;;  %s6658_s3 = inlined_call_operand.vmem [shape: bf16[5,112,112], index: 3, kind: input, shape index: {}]   ;;  %s6659_s2 = inlined_call_operand.vmem [shape: f32[1,112], index: 2, kind: input, shape index: {}]   ;;  %s6660_s5 = inlined_call_operand.vmem [shape: bf16[5,112,128], index: 5, kind: input, shape index: {}]   ;;  %s6661_s4 = inlined_call_operand.vmem [shape: f32[1,112], index: 4, kind: input, shape index: {}]   ;;  %s6662_s7 = inlined_call_operand.vmem [shape: bf16[4,128,8], index: 7, kind: input, shape index: {}]   ;;  %s6663_s6 = inlined_call_operand.vmem [shape: f32[1,128], index: 6, kind: input, shape index: {}]   ;;  %s6664_s8 = inlined_call_operand.vmem [shape: f32[1,8], index: 8, kind: input, shape index: {}]   ;;  %s6665_s9 = inlined_call_operand.vmem [shape: f32[16,8], index: 9, kind: output, shape index: {}]  }
   0x1   :  { %v5380_v0 = vld [vmem:[%s6656_s1 + $0x10] sm:$0xff]   ;;  %v5381_v1 = vld [vmem:[%s6656_s1 + $0x18] sm:$0x3f]   ;;  %v5382_v2 = vld [vmem:[%s6657_s0 + $0x80] sm:$0xff]   ;;  %4828 = vmatprep.subr.bf16.mxu1 %v5562_v52  ;;  %vm5564_vm3 = vmmov 0   ;;  %vm3877_vm4 = vcmask 64512  }
   0x2   :  { %4668 = vmatprep.subr.bf16.mxu0 %v5380_v0  ;;  %v225_v3 = vsel %vm223_vm0, %v5381_v1, 0  ;;  %4672 = vmatprep.mubr.msk.bf16.mxu0 %vm180_vm1, %v5382_v2  ;;  %v5384_v4 = vld [vmem:[%s6656_s1] sm:$0xff]   ;;  %v5383_v5 = vld [vmem:[%s6657_s0 + $0x88] sm:$0xff]   ;;  %v5385_v6 = vld [vmem:[%s6657_s0 + $0x90] sm:$0xff]  }
   0x3   :  { %4669 = vmatpush3.bf16.msra.mxu0 %v5380_v0  ;;  %v5391_v7 = vld [vmem:[%s6656_s1 + $0x8] sm:$0x3f]   ;;  %v5386_v9 = vld [vmem:[%s6657_s0 + $0x98] sm:$0xff]   ;;  %v5387_v10 = vld [vmem:[%s6657_s0 + $0xa0] sm:$0xff]   ;;  %4842 = vmatprep.mubr.msk.bf16.mxu1 %vm5564_vm3, %v5562_v52 }
   0x4   :  { %5372 = vmatprep.subr.msk.bf16.mxu0 %vm223_vm0, %v5381_v1  ;;  %v496_v8 = vsel %vm223_vm0, %v5391_v7, 0  ;;  %v5400_v11 = vld [vmem:[%s6656_s1 + $0x20] sm:$0xff]   ;;  %v5388_v12 = vld [vmem:[%s6657_s0 + $0xa8] sm:$0xff]   ;;  %v5389_v13 = vld [vmem:[%s6657_s0 + $0xb0] sm:$0xff]  }
   0x5   :  { %v5390_v14 = vld [vmem:[%s6657_s0 + $0xb8] sm:$0xff]   ;;  %v5392_v15 = vld [vmem:[%s6657_s0 + $0xc0] sm:$0xff]   ;;  %v5393_v16 = vld [vmem:[%s6657_s0 + $0xc8] sm:$0xff]  }
   0x6   :  { %v5394_v17 = vld [vmem:[%s6657_s0 + $0xd0] sm:$0xff]   ;;  %v5395_v18 = vld [vmem:[%s6657_s0 + $0xd8] sm:$0xff]   ;;  %v5396_v19 = vld [vmem:[%s6657_s0 + $0xe0] sm:$0xff]  }
   0x7   :  { %4671 = vmatpush3.bf16.msra.mxu0 %v225_v3  ;;  %v5397_v20 = vld [vmem:[%s6657_s0 + $0xe8] sm:$0xff]   ;;  %v5398_v21 = vld [vmem:[%s6657_s0] sm:$0xff]   ;;  %v5401_v23 = vld [vmem:[%s6657_s0 + $0x10] sm:$0xff]  }
   0x8   :  { %4700 = vmatprep.subr.bf16.mxu0 %v5384_v4  ;;  %v5399_v22 = vld [vmem:[%s6657_s0 + $0x8] sm:$0xff]   ;;  %v5416_v26 = vld [vmem:[%s6656_s1 + $0x30] sm:$0xff]   ;;  %v5402_v27 = vld [vmem:[%s6657_s0 + $0x18] sm:$0xff]  }
   0x9   :  { %v5407_v24 = vld [vmem:[%s6656_s1 + $0x28] sm:$0x3f]   ;;  %v5403_v28 = vld [vmem:[%s6657_s0 + $0x20] sm:$0xff]   ;;  %v5405_v30 = vld [vmem:[%s6657_s0 + $0x30] sm:$0xff]  }
   0xa   :  { %4673 = vmatmul.mubr.msk.bf16.vlgmr.msra.gmra.mrb[0].mxu0 %vm180_vm1, %v5383_v5  ;;  %v800_v25 = vsel %vm223_vm0, %v5407_v24, 0  ;;  %v5404_v29 = vld [vmem:[%s6657_s0 + $0x28] sm:$0xff]   ;;  %v5406_v31 = vld [vmem:[%s6657_s0 + $0x38] sm:$0xff]   ;;  %v5408_v32 = vld [vmem:[%s6657_s0 + $0x40] sm:$0xff]  }
   0xb   :  { %4701 = vmatpush3.bf16.msra.mxu0 %v5384_v4  ;;  %4676 = vmatprep.mubr.msk.bf16.mxu0 %vm180_vm1, %v5385_v6  ;;  %v5409_v33 = vld [vmem:[%s6657_s0 + $0x48] sm:$0xff]   ;;  %v5410_v34 = vld [vmem:[%s6657_s0 + $0x50] sm:$0xff]   ;;  %v5411_v35 = vld [vmem:[%s6657_s0 + $0x58] sm:$0xff]  }
   0xc   :  { %5373 = vmatprep.subr.msk.bf16.mxu0 %vm223_vm0, %v5391_v7  ;;  %v5412_v36 = vld [vmem:[%s6657_s0 + $0x60] sm:$0xff]   ;;  %v5413_v37 = vld [vmem:[%s6657_s0 + $0x68] sm:$0xff]   ;;  %v5415_v39 = vld [vmem:[%s6657_s0 + $0x10] sm:$0xff]  }
   0xd   :  { %v5414_v38 = vld [vmem:[%s6657_s0 + $0x8] sm:$0xff]   ;;  %v5417_v40 = vld [vmem:[%s6657_s0 + $0x18] sm:$0xff]   ;;  %v5432_v43 = vld [vmem:[%s6656_s1 + $0x40] sm:$0xff]  }
   0xe   :  { %v5423_v41 = vld [vmem:[%s6656_s1 + $0x38] sm:$0x3f]   ;;  %v5418_v44 = vld [vmem:[%s6657_s0 + $0x20] sm:$0xff]   ;;  %v5419_v45 = vld [vmem:[%s6657_s0 + $0x28] sm:$0xff]  }
   0xf   :  { %4703 = vmatpush3.bf16.msra.mxu0 %v496_v8  ;;  %v1132_v42 = vsel %vm223_vm0, %v5423_v41, 0  ;;  %v5420_v46 = vld [vmem:[%s6657_s0 + $0x30] sm:$0xff]   ;;  %v5421_v47 = vld [vmem:[%s6657_s0 + $0x38] sm:$0xff]   ;;  %v5422_v48 = vld [vmem:[%s6657_s0 + $0x40] sm:$0xff]  }
  0x10   :  { %4732 = vmatprep.subr.bf16.mxu0 %v5400_v11  ;;  %v5424_v49 = vld [vmem:[%s6657_s0 + $0x48] sm:$0xff]   ;;  %v5425_v50 = vld [vmem:[%s6657_s0 + $0x50] sm:$0xff]   ;;  %v5426_v51 = vld [vmem:[%s6657_s0 + $0x58] sm:$0xff]  }
  0x11   :  { %v5460_v53 = vld [vmem:[%s6658_s3 + $0x38] sm:$0xff]   ;;  %v5427_v54 = vld [vmem:[%s6657_s0 + $0x60] sm:$0xff]   ;;  %v5428_v56 = vld [vmem:[%s6657_s0 + $0x68] sm:$0xff]  }
  0x12   :  { %4677 = vmatmul.mubr.msk.bf16.gmra.mrb[4].mxu0 %vm180_vm1, %v5386_v9  ;;  %4829 = vmatpush3.bf16.msra.mxu1 %v5460_v53  ;;  %v5461_v55 = vld [vmem:[%s6658_s3 + $0x40] sm:$0xff]   ;;  %v5462_v57 = vld [vmem:[%s6658_s3 + $0x48] sm:$0xff]   ;;  %v5463_v58 = vld [vmem:[%s6658_s3 + $0x50] sm:$0xff]  }
  0x13   :  { %4680 = vmatprep.mubr.msk.bf16.mxu0 %vm180_vm1, %v5387_v10  ;;  %4830 = vmatprep.subr.bf16.mxu1 %v5562_v52  ;;  %v5429_v59 = vld [vmem:[%s6657_s0 + $0x70] sm:$0xff]   ;;  %v5430_v60 = vld [vmem:[%s6657_s0 + $0x88] sm:$0xff]   ;;  %v5464_v61 = vld [vmem:[%s6658_s3 + $0x58] sm:$0xff]  }
  0x14   :  { %v5431_v62 = vld [vmem:[%s6657_s0 + $0x90] sm:$0xff]   ;;  %v5433_v63 = vld [vmem:[%s6657_s0 + $0x98] sm:$0xff]   ;;  %v5439_v0 = vld [vmem:[%s6656_s1 + $0x48] sm:$0x3f]  }
  0x15   :  { %v1464_v1 = vsel %vm223_vm0, %v5439_v0, 0  ;;  %v5434_v2 = vld [vmem:[%s6657_s0 + $0xa0] sm:$0xff]   ;;  %v5435_v3 = vld [vmem:[%s6657_s0 + $0xa8] sm:$0xff]   ;;  %v5436_v4 = vld [vmem:[%s6657_s0 + $0xb0] sm:$0xff]  }
  0x16   :  { %4831 = vmatpush3.bf16.msra.mxu1 %v5461_v55  ;;  %v5437_v5 = vld [vmem:[%s6657_s0 + $0xb8] sm:$0xff]   ;;  %v5438_v6 = vld [vmem:[%s6657_s0 + $0xc0] sm:$0xff]   ;;  %v5440_v7 = vld [vmem:[%s6657_s0 + $0xc8] sm:$0xff]  }
  0x17   :  { %4832 = vmatprep.subr.bf16.mxu1 %v5562_v52  ;;  %v5441_v8 = vld [vmem:[%s6657_s0 + $0xd0] sm:$0xff]   ;;  %v5442_v9 = vld [vmem:[%s6657_s0 + $0xd8] sm:$0xff]   ;;  %v5443_v10 = vld [vmem:[%s6657_s0 + $0xe0] sm:$0xff]  }
  0x1a   :  { %4681 = vmatmul.mubr.msk.bf16.gmra.mrb[8].mxu0 %vm180_vm1, %v5388_v12  ;;  %4833 = vmatpush3.bf16.msra.mxu1 %v5462_v57  ;;  %v5445_v12 = vld [vmem:[%s6657_s0 + $0xf0] sm:$0xff]  }
  0x1b   :  { %4684 = vmatprep.mubr.msk.bf16.mxu0 %vm180_vm1, %v5389_v13  ;;  %4834 = vmatprep.subr.bf16.mxu1 %v5562_v52  ;;  %v5446_v13 = vld [vmem:[%s6657_s0 + $0x10] sm:$0xff]  }
  0x1e   :  { %4835 = vmatpush3.bf16.msra.mxu1 %v5463_v58 }
  0x1f   :  { %4836 = vmatprep.subr.bf16.mxu1 %v5562_v52 }
  0x22   :  { %4685 = vmatmul.mubr.msk.bf16.gmra.mrb[12].mxu0 %vm180_vm1, %v5390_v14  ;;  %4837 = vmatpush3.bf16.msra.mxu1 %v5464_v61  ;;  %v5447_v14 = vld [vmem:[%s6657_s0 + $0x18] sm:$0xff]  }
  0x23   :  { %4688 = vmatprep.mubr.msk.bf16.mxu0 %vm180_vm1, %v5392_v15  ;;  %4838 = vmatprep.subr.bf16.mxu1 %v5562_v52  ;;  %v5448_v15 = vld [vmem:[%s6657_s0 + $0x20] sm:$0xff]  }
  0x2a   :  { %4689 = vmatmul.mubr.msk.bf16.gmra.mrb[16].mxu0 %vm180_vm1, %v5393_v16  ;;  %v5449_v16 = vld [vmem:[%s6657_s0 + $0x28] sm:$0xff]  }
  0x2b   :  { %4692 = vmatprep.mubr.msk.bf16.mxu0 %vm180_vm1, %v5394_v17  ;;  %v5450_v17 = vld [vmem:[%s6657_s0 + $0x30] sm:$0xff]  }
  0x32   :  { %4693 = vmatmul.mubr.msk.bf16.gmra.mrb[20].mxu0 %vm180_vm1, %v5395_v18  ;;  %v5451_v18 = vld [vmem:[%s6657_s0 + $0x38] sm:$0xff]  }
  0x33   :  { %4696 = vmatprep.mubr.msk.bf16.mxu0 %vm180_vm1, %v5396_v19  ;;  %v5452_v19 = vld [vmem:[%s6657_s0 + $0x40] sm:$0xff]  }
  0x3a   :  { %4697 = vmatmul.mubr.msk.bf16.gmra.mrb[24].mxu0 %vm180_vm1, %v5397_v20  ;;  %v5453_v20 = vld [vmem:[%s6657_s0 + $0x48] sm:$0xff]  }
  0x3b   :  { %4704 = vmatprep.mubr.msk.bf16.mxu0 %vm180_vm1, %v5398_v21  ;;  %v5454_v21 = vld [vmem:[%s6657_s0 + $0x50] sm:$0xff]  }
  0x42   :  { %4705 = vmatmul.mubr.msk.bf16.vlgmr.msra.gmra.mrb[0].mxu0 %vm180_vm1, %v5399_v22  ;;  %v5455_v22 = vld [vmem:[%s6657_s0 + $0x58] sm:$0xff]  }
  0x43   :  { %4733 = vmatpush3.bf16.msra.mxu0 %v5400_v11  ;;  %4708 = vmatprep.mubr.msk.bf16.mxu0 %vm180_vm1, %v5401_v23  ;;  %v5444_v11 = vld [vmem:[%s6657_s0 + $0xe8] sm:$0xff]   ;;  %v5456_v23 = vld [vmem:[%s6657_s0 + $0x60] sm:$0xff]  }
  0x44   :  { %5374 = vmatprep.subr.msk.bf16.mxu0 %vm223_vm0, %v5407_v24  ;;  %v5457_v24 = vld [vmem:[%s6657_s0 + $0x68] sm:$0xff]  }
  0x47   :  { %4735 = vmatpush3.bf16.msra.mxu0 %v800_v25  ;;  %v5458_v25 = vld [vmem:[%s6657_s0 + $0x70] sm:$0xff]  }
  0x48   :  { %4764 = vmatprep.subr.bf16.mxu0 %v5416_v26 }
  0x4a   :  { %4709 = vmatmul.mubr.msk.bf16.gmra.mrb[4].mxu0 %vm180_vm1, %v5402_v27  ;;  %v5465_v27 = vld [vmem:[%s6658_s3 + $0x60] sm:$0xff]  }
  0x4b   :  { %4712 = vmatprep.mubr.msk.bf16.mxu0 %vm180_vm1, %v5403_v28  ;;  %v5563_v28 = vmov 0   ;;  %4839 = vmatpush3.bf16.msra.mxu1 %v5465_v27 }
  0x4c   :  { %1720 = vst.msk [vmem:[#allocation2 + $0x48] sm:$0xff] %vm1716_vm2, %v5563_v28  ;;  %1717 = vst.msk [vmem:[#allocation2] sm:$0xff] %vm1716_vm2, %v5563_v28  ;;  %4840 = vmatprep.subr.bf16.mxu1 %v5562_v52 }
  0x4d   :  { %1718 = vst.msk [vmem:[#allocation2 + $0x40] sm:$0xff] %vm1716_vm2, %v5563_v28  ;;  %2689 = vst.msk [vmem:[#allocation3] sm:$0xff] %vm1716_vm2, %v5563_v28 }
  0x4e   :  { %2690 = vst.msk [vmem:[#allocation3 + $0x28] sm:$0xff] %vm1716_vm2, %v5563_v28  ;;  %2692 = vst.msk [vmem:[#allocation3 + $0x30] sm:$0xff] %vm1716_vm2, %v5563_v28 }
  0x4f   :  { %2693 = vst.msk [vmem:[#allocation3 + $0x50] sm:$0xff] %vm1716_vm2, %v5563_v28 }
  0x52   :  { %4713 = vmatmul.mubr.msk.bf16.gmra.mrb[8].mxu0 %vm180_vm1, %v5404_v29  ;;  %v5466_v29 = vld [vmem:[%s6658_s3 + $0x68] sm:$0xff]  }
  0x53   :  { %4716 = vmatprep.mubr.msk.bf16.mxu0 %vm180_vm1, %v5405_v30  ;;  %4841 = vmatpush3.bf16.msra.mxu1 %v5466_v29  ;;  %v1757_v30 = vld [vmem:[#allocation2 + $0x48] sm:$0xff] }
  0x54   :  { %4870 = vmatprep.subr.bf16.mxu1 %v5562_v52 }
  0x56   :  { %4843 = vmatmul.mubr.msk.bf16.vlgmr.msra.gmra.mrb[0].mxu1 %vm1716_vm2, %v1757_v30 }
  0x57   :  { %4846 = vmatprep.mubr.msk.bf16.mxu1 %vm5564_vm3, %v5562_v52 }
  0x5a   :  { %4717 = vmatmul.mubr.msk.bf16.gmra.mrb[12].mxu0 %vm180_vm1, %v5406_v31  ;;  %v5467_v31 = vld [vmem:[%s6658_s3] sm:$0xff]  }
  0x5b   :  { %4720 = vmatprep.mubr.msk.bf16.mxu0 %vm180_vm1, %v5408_v32  ;;  %4871 = vmatpush3.bf16.msra.mxu1 %v5467_v31  ;;  %v5468_v32 = vld [vmem:[%s6658_s3 + $0x8] sm:$0xff]  }
  0x5c   :  { %4872 = vmatprep.subr.bf16.mxu1 %v5562_v52 }
  0x5f   :  { %4873 = vmatpush3.bf16.msra.mxu1 %v5468_v32 }
  0x60   :  { %4874 = vmatprep.subr.bf16.mxu1 %v5562_v52 }
  0x62   :  { %4721 = vmatmul.mubr.msk.bf16.gmra.mrb[16].mxu0 %vm180_vm1, %v5409_v33  ;;  %v5469_v33 = vld [vmem:[%s6658_s3 + $0x10] sm:$0xff]  }
  0x63   :  { %4724 = vmatprep.mubr.msk.bf16.mxu0 %vm180_vm1, %v5410_v34  ;;  %4875 = vmatpush3.bf16.msra.mxu1 %v5469_v33  ;;  %v5470_v34 = vld [vmem:[%s6658_s3 + $0x18] sm:$0xff]  }
  0x64   :  { %4876 = vmatprep.subr.bf16.mxu1 %v5562_v52 }
  0x67   :  { %4877 = vmatpush3.bf16.msra.mxu1 %v5470_v34 }
  0x68   :  { %4878 = vmatprep.subr.bf16.mxu1 %v5562_v52 }
  0x6a   :  { %4725 = vmatmul.mubr.msk.bf16.gmra.mrb[20].mxu0 %vm180_vm1, %v5411_v35  ;;  %v5471_v35 = vld [vmem:[%s6658_s3 + $0x20] sm:$0xff]  }
  0x6b   :  { %4728 = vmatprep.mubr.msk.bf16.mxu0 %vm180_vm1, %v5412_v36  ;;  %4879 = vmatpush3.bf16.msra.mxu1 %v5471_v35  ;;  %v5472_v36 = vld [vmem:[%s6658_s3 + $0x28] sm:$0xff]  }
  0x6c   :  { %4880 = vmatprep.subr.bf16.mxu1 %v5562_v52 }
  0x6f   :  { %4881 = vmatpush3.bf16.msra.mxu1 %v5472_v36 }
  0x70   :  { %4882 = vmatprep.subr.bf16.mxu1 %v5562_v52 }
  0x72   :  { %4729 = vmatmul.mubr.msk.bf16.gmra.mrb[24].mxu0 %vm180_vm1, %v5413_v37  ;;  %v5473_v37 = vld [vmem:[%s6658_s3 + $0x30] sm:$0xff]  }
  0x73   :  { %4736 = vmatprep.mubr.msk.bf16.mxu0 %vm180_vm1, %v5414_v38  ;;  %4883 = vmatpush3.bf16.msra.mxu1 %v5473_v37  ;;  %v6007_v38 = vld [vmem:[%s6659_s2] ss:$0 sm:$0xff] }
  0x74   :  { %4912 = vmatprep.subr.bf16.mxu1 %v5562_v52 }
  0x7a   :  { %4737 = vmatmul.mubr.msk.bf16.vlgmr.msra.gmra.mrb[0].mxu0 %vm180_vm1, %v5415_v39 }
  0x7b   :  { %4765 = vmatpush3.bf16.msra.mxu0 %v5416_v26  ;;  %4740 = vmatprep.mubr.msk.bf16.mxu0 %vm180_vm1, %v5417_v40  ;;  %v5459_v26 = vld [vmem:[%s6657_s0 + $0x78] sm:$0xff]  }
  0x7c   :  { %5375 = vmatprep.subr.msk.bf16.mxu0 %vm223_vm0, %v5423_v41 }
  0x7f   :  { %4767 = vmatpush3.bf16.msra.mxu0 %v1132_v42 }
  0x80   :  { %4796 = vmatprep.subr.bf16.mxu0 %v5432_v43 }
  0x82   :  { %4741 = vmatmul.mubr.msk.bf16.gmra.mrb[4].mxu0 %vm180_vm1, %v5418_v44 }
  0x83   :  { %4744 = vmatprep.mubr.msk.bf16.mxu0 %vm180_vm1, %v5419_v45 }
  0x8a   :  { %4745 = vmatmul.mubr.msk.bf16.gmra.mrb[8].mxu0 %vm180_vm1, %v5420_v46 }
  0x8b   :  { %4748 = vmatprep.mubr.msk.bf16.mxu0 %vm180_vm1, %v5421_v47 }
  0x92   :  { %4749 = vmatmul.mubr.msk.bf16.gmra.mrb[12].mxu0 %vm180_vm1, %v5422_v48 }
  0x93   :  { %4752 = vmatprep.mubr.msk.bf16.mxu0 %vm180_vm1, %v5424_v49 }
  0x9a   :  { %4753 = vmatmul.mubr.msk.bf16.gmra.mrb[16].mxu0 %vm180_vm1, %v5425_v50 }
  0x9b   :  { %4756 = vmatprep.mubr.msk.bf16.mxu0 %vm180_vm1, %v5426_v51 }
  0xa2   :  { %4757 = vmatmul.mubr.msk.bf16.gmra.mrb[20].mxu0 %vm180_vm1, %v5427_v54 }
  0xa3   :  { %4760 = vmatprep.mubr.msk.bf16.mxu0 %vm180_vm1, %v5428_v56 }
  0xaa   :  { %4761 = vmatmul.mubr.msk.bf16.gmra.mrb[24].mxu0 %vm180_vm1, %v5429_v59 }
  0xab   :  { %4768 = vmatprep.mubr.msk.bf16.mxu0 %vm180_vm1, %v5430_v60 }
  0xb2   :  { %4769 = vmatmul.mubr.msk.bf16.vlgmr.msra.gmra.mrb[0].mxu0 %vm180_vm1, %v5431_v62 }
  0xb3   :  { %4797 = vmatpush3.bf16.msra.mxu0 %v5432_v43  ;;  %4772 = vmatprep.mubr.msk.bf16.mxu0 %vm180_vm1, %v5433_v63 }
  0xb4   :  { %5376 = vmatprep.subr.msk.bf16.mxu0 %vm223_vm0, %v5439_v0 }
  0xb7   :  { %4799 = vmatpush3.bf16.msra.mxu0 %v1464_v1 }
  0xba   :  { %4773 = vmatmul.mubr.msk.bf16.gmra.mrb[4].mxu0 %vm180_vm1, %v5434_v2 }
  0xbb   :  { %4776 = vmatprep.mubr.msk.bf16.mxu0 %vm180_vm1, %v5435_v3 }
  0xc2   :  { %4777 = vmatmul.mubr.msk.bf16.gmra.mrb[8].mxu0 %vm180_vm1, %v5436_v4 }
  0xc3   :  { %4780 = vmatprep.mubr.msk.bf16.mxu0 %vm180_vm1, %v5437_v5 }
  0xca   :  { %4781 = vmatmul.mubr.msk.bf16.gmra.mrb[12].mxu0 %vm180_vm1, %v5438_v6 }
  0xcb   :  { %4784 = vmatprep.mubr.msk.bf16.mxu0 %vm180_vm1, %v5440_v7 }
  0xd2   :  { %4785 = vmatmul.mubr.msk.bf16.gmra.mrb[16].mxu0 %vm180_vm1, %v5441_v8 }
  0xd3   :  { %4788 = vmatprep.mubr.msk.bf16.mxu0 %vm180_vm1, %v5442_v9 }
  0xda   :  { %4789 = vmatmul.mubr.msk.bf16.gmra.mrb[20].mxu0 %vm180_vm1, %v5443_v10 }
  0xdb   :  { %4792 = vmatprep.mubr.msk.bf16.mxu0 %vm180_vm1, %v5444_v11 }
  0xe2   :  { %4793 = vmatmul.mubr.msk.bf16.gmra.mrb[24].mxu0 %vm180_vm1, %v5445_v12 }
  0xe3   :  { %4800 = vmatprep.mubr.msk.bf16.mxu0 %vm180_vm1, %v5446_v13 }
  0xea   :  { %4801 = vmatmul.mubr.msk.bf16.vlgmr.msra.gmra.mrb[0].mxu0 %vm180_vm1, %v5447_v14 }
  0xeb   :  { %4804 = vmatprep.mubr.msk.bf16.mxu0 %vm180_vm1, %v5448_v15 }
  0xf2   :  { %4805 = vmatmul.mubr.msk.bf16.gmra.mrb[4].mxu0 %vm180_vm1, %v5449_v16 }
  0xf3   :  { %4808 = vmatprep.mubr.msk.bf16.mxu0 %vm180_vm1, %v5450_v17 }
  0xfa   :  { %4809 = vmatmul.mubr.msk.bf16.gmra.mrb[8].mxu0 %vm180_vm1, %v5451_v18 }
  0xfb   :  { %4812 = vmatprep.mubr.msk.bf16.mxu0 %vm180_vm1, %v5452_v19 }
 0x102   :  { %4813 = vmatmul.mubr.msk.bf16.gmra.mrb[12].mxu0 %vm180_vm1, %v5453_v20 }
 0x103   :  { %4816 = vmatprep.mubr.msk.bf16.mxu0 %vm180_vm1, %v5454_v21 }
 0x10a   :  { %4817 = vmatmul.mubr.msk.bf16.gmra.mrb[16].mxu0 %vm180_vm1, %v5455_v22 }
 0x10b   :  { %4820 = vmatprep.mubr.msk.bf16.mxu0 %vm180_vm1, %v5456_v23 }
 0x112   :  { %4821 = vmatmul.mubr.msk.bf16.gmra.mrb[20].mxu0 %vm180_vm1, %v5457_v24 }
 0x113   :  { %4824 = vmatprep.mubr.msk.bf16.mxu0 %vm180_vm1, %v5458_v25 }
 0x11a   :  { %4825 = vmatmul.mubr.msk.bf16.gmra.mrb[24].mxu0 %vm180_vm1, %v5459_v26 }
 0x1bd   :  { %v4802_v39 = vpop.f32.mrb[0].mxu0 }
 0x1be   :  { %v1648_v40 = vadd.f32 %v4802_v39, %v6007_v38  ;;  %v1500_v41 = vpop.f32.mrb[1].mxu0 }
 0x1bf   :  { %v1646_v42 = vadd.f32 %v6007_v38, %v1500_v41  ;;  %v4803_v43 = vpop.f32.mrb[2].mxu0 }
 0x1c0   :  { %v1649_v44 = vadd.f32 %v4803_v43, %v6007_v38  ;;  %v1503_v45 = vpop.f32.mrb[3].mxu0  ;;  %v1676_v47 = vmax.f32 %v1648_v40, 0.0 }
 0x1c1   :  { %v1647_v46 = vadd.f32 %v6007_v38, %v1503_v45  ;;  %v1674_v49 = vmax.f32 %v1646_v42, 0.0 }
 0x1c2   :  { %v1677_v48 = vmax.f32 %v1649_v44, 0.0 }
 0x1c3   :  { %v1675_v50 = vmax.f32 %v1647_v46, 0.0 }
 0x1c4   :  { %v1703_v51 = vpack.c.bf16 %v1677_v48, %v1676_v47 }
 0x1c5   :  { %v1702_v53 = vpack.c.bf16 %v1675_v50, %v1674_v49  ;;  %v4806_v54 = vpop.f32.mrb[4].mxu0 }
 0x1c6   :  { %1723 = vst.msk [vmem:[#allocation2 + $0x50] sm:$0xff] %vm1716_vm2, %v1703_v51  ;;  %v1652_v55 = vadd.f32 %v4806_v54, %v6007_v38  ;;  %v1516_v56 = vpop.f32.mrb[5].mxu0 }
 0x1c7   :  { %1722 = vst.msk [vmem:[#allocation2 + $0x8] sm:$0xff] %vm1716_vm2, %v1702_v53  ;;  %v1650_v57 = vadd.f32 %v6007_v38, %v1516_v56  ;;  %v4807_v58 = vpop.f32.mrb[6].mxu0 }
 0x1c8   :  { %v1653_v59 = vadd.f32 %v4807_v58, %v6007_v38  ;;  %v1519_v60 = vpop.f32.mrb[7].mxu0  ;;  %v1680_v62 = vmax.f32 %v1652_v55, 0.0 }
 0x1c9   :  { %v1651_v61 = vadd.f32 %v6007_v38, %v1519_v60  ;;  %v1678_v0 = vmax.f32 %v1650_v57, 0.0 }
 0x1ca   :  { %v1681_v63 = vmax.f32 %v1653_v59, 0.0 }
 0x1cb   :  { %v1679_v1 = vmax.f32 %v1651_v61, 0.0 }
 0x1cc   :  { %v1705_v2 = vpack.c.bf16 %v1681_v63, %v1680_v62 }
 0x1cd   :  { %v1704_v3 = vpack.c.bf16 %v1679_v1, %v1678_v0  ;;  %v4810_v4 = vpop.f32.mrb[8].mxu0  ;;  %v6019_v5 = vld [vmem:[#allocation2 + $0x50] sm:$0xff] }
 0x1ce   :  { %1725 = vst.msk [vmem:[#allocation2 + $0x58] sm:$0xff] %vm1716_vm2, %v1705_v2  ;;  %v1656_v6 = vadd.f32 %v4810_v4, %v6007_v38  ;;  %v1532_v7 = vpop.f32.mrb[9].mxu0  ;;  %4847 = vmatmul.mubr.msk.bf16.gmra.mrb[4].mxu1 %vm1716_vm2, %v6019_v5 }
 0x1cf   :  { %1724 = vst.msk [vmem:[#allocation2 + $0x10] sm:$0xff] %vm1716_vm2, %v1704_v3  ;;  %v1654_v8 = vadd.f32 %v6007_v38, %v1532_v7  ;;  %v4811_v9 = vpop.f32.mrb[10].mxu0  ;;  %4850 = vmatprep.mubr.msk.bf16.mxu1 %vm5564_vm3, %v5562_v52 }
 0x1d0   :  { %v1657_v10 = vadd.f32 %v4811_v9, %v6007_v38  ;;  %v1535_v11 = vpop.f32.mrb[11].mxu0  ;;  %v1684_v13 = vmax.f32 %v1656_v6, 0.0 }
 0x1d1   :  { %v1655_v12 = vadd.f32 %v6007_v38, %v1535_v11  ;;  %v1682_v15 = vmax.f32 %v1654_v8, 0.0 }
 0x1d2   :  { %v1685_v14 = vmax.f32 %v1657_v10, 0.0 }
 0x1d3   :  { %v1683_v16 = vmax.f32 %v1655_v12, 0.0 }
 0x1d4   :  { %v1707_v17 = vpack.c.bf16 %v1685_v14, %v1684_v13 }
 0x1d5   :  { %v1706_v18 = vpack.c.bf16 %v1683_v16, %v1682_v15  ;;  %v4814_v19 = vpop.f32.mrb[12].mxu0  ;;  %v6031_v20 = vld [vmem:[#allocation2 + $0x58] sm:$0xff] }
 0x1d6   :  { %1727 = vst.msk [vmem:[#allocation2 + $0x60] sm:$0xff] %vm1716_vm2, %v1707_v17  ;;  %v1660_v21 = vadd.f32 %v4814_v19, %v6007_v38  ;;  %v1548_v22 = vpop.f32.mrb[13].mxu0  ;;  %4851 = vmatmul.mubr.msk.bf16.gmra.mrb[8].mxu1 %vm1716_vm2, %v6031_v20  ;;  %v1736_v19 = vld [vmem:[#allocation2] sm:$0xff] }
 0x1d7   :  { %1726 = vst.msk [vmem:[#allocation2 + $0x18] sm:$0xff] %vm1716_vm2, %v1706_v18  ;;  %v1658_v23 = vadd.f32 %v6007_v38, %v1548_v22  ;;  %v4815_v24 = vpop.f32.mrb[14].mxu0  ;;  %4854 = vmatprep.mubr.msk.bf16.mxu1 %vm5564_vm3, %v5562_v52  ;;  %v5476_v22 = vld [vmem:[%s6658_s3 + $0x80] sm:$0xff]  }
 0x1d8   :  { %v1661_v25 = vadd.f32 %v4815_v24, %v6007_v38  ;;  %v1551_v26 = vpop.f32.mrb[15].mxu0  ;;  %v1688_v28 = vmax.f32 %v1660_v21, 0.0  ;;  %v5475_v21 = vld [vmem:[%s6658_s3 + $0x78] sm:$0xff]   ;;  %v5477_v24 = vld [vmem:[%s6658_s3 + $0x88] sm:$0xff]  }
 0x1d9   :  { %v1659_v27 = vadd.f32 %v6007_v38, %v1551_v26  ;;  %v1686_v30 = vmax.f32 %v1658_v23, 0.0  ;;  %v1737_v23 = vld [vmem:[#allocation2 + $0x8] sm:$0xff]  ;;  %v6112_v26 = vld [vmem:[#allocation2 + $0x10] sm:$0xff] }
 0x1da   :  { %v1689_v29 = vmax.f32 %v1661_v25, 0.0  ;;  %v5478_v25 = vld [vmem:[%s6658_s3 + $0x90] sm:$0xff]  }
 0x1db   :  { %v1687_v31 = vmax.f32 %v1659_v27, 0.0  ;;  %v5479_v27 = vld [vmem:[%s6658_s3 + $0x98] sm:$0xff]  }
 0x1dc   :  { %v1709_v32 = vpack.c.bf16 %v1689_v29, %v1688_v28  ;;  %v5480_v28 = vld [vmem:[%s6658_s3 + $0xa0] sm:$0xff]  }
 0x1dd   :  { %v1708_v33 = vpack.c.bf16 %v1687_v31, %v1686_v30  ;;  %v4818_v34 = vpop.f32.mrb[16].mxu0  ;;  %v6043_v35 = vld [vmem:[#allocation2 + $0x60] sm:$0xff]  ;;  %v6130_v30 = vpop.f32.mrb[0].mxu1 }
 0x1de   :  { %1729 = vst.msk [vmem:[#allocation2 + $0x68] sm:$0xff] %vm1716_vm2, %v1709_v32  ;;  %v1664_v36 = vadd.f32 %v4818_v34, %v6007_v38  ;;  %v1564_v37 = vpop.f32.mrb[17].mxu0  ;;  %4855 = vmatmul.mubr.msk.bf16.gmra.mrb[12].mxu1 %vm1716_vm2, %v6043_v35  ;;  %v6126_v29 = vld [vmem:[#allocation2 + $0x18] sm:$0xff]  ;;  %v4844_v31 = vpop.f32.mrb[1].mxu1 }
 0x1df   :  { %1728 = vst.msk [vmem:[#allocation2 + $0x20] sm:$0xff] %vm1716_vm2, %v1708_v33  ;;  %v1662_v39 = vadd.f32 %v6007_v38, %v1564_v37  ;;  %v4819_v40 = vpop.f32.mrb[18].mxu0  ;;  %4858 = vmatprep.mubr.msk.bf16.mxu1 %vm5564_vm3, %v5562_v52  ;;  %v6135_v32 = vpop.f32.mrb[2].mxu1 }
 0x1e0   :  { %v1665_v41 = vadd.f32 %v4819_v40, %v6007_v38  ;;  %v1567_v42 = vpop.f32.mrb[19].mxu0  ;;  %v1692_v44 = vmax.f32 %v1664_v36, 0.0  ;;  %v4845_v33 = vpop.f32.mrb[3].mxu1  ;;  %v5482_v40 = vld [vmem:[%s6658_s3 + $0xb0] sm:$0xff]  }
 0x1e1   :  { %v1663_v43 = vadd.f32 %v6007_v38, %v1567_v42  ;;  %v1690_v46 = vmax.f32 %v1662_v39, 0.0  ;;  %v5481_v39 = vld [vmem:[%s6658_s3 + $0xa8] sm:$0xff]   ;;  %v5484_v42 = vld [vmem:[%s6658_s3 + $0xc0] sm:$0xff]   ;;  %v5495_v33 = vld [vmem:[%s6660_s5 + $0x38] sm:$0xff]  }
 0x1e2   :  { %v1693_v45 = vmax.f32 %v1665_v41, 0.0  ;;  %v5483_v41 = vld [vmem:[%s6658_s3 + $0xb8] sm:$0xff]   ;;  %5038 = vmatprep.subr.bf16.mxu0 %v5495_v33 }
 0x1e3   :  { %v1691_v47 = vmax.f32 %v1663_v43, 0.0  ;;  %v5485_v43 = vld [vmem:[%s6658_s3 + $0xc8] sm:$0xff]   ;;  %5039 = vmatpush3.bf16.msra.mxu0 %v5495_v33 }
 0x1e4   :  { %v1711_v48 = vpack.c.bf16 %v1693_v45, %v1692_v44  ;;  %v5486_v44 = vld [vmem:[%s6658_s3 + $0xd0] sm:$0xff]   ;;  %v5487_v45 = vld [vmem:[%s6658_s3 + $0xd8] sm:$0xff]  }
 0x1e5   :  { %v1710_v49 = vpack.c.bf16 %v1691_v47, %v1690_v46  ;;  %v4822_v50 = vpop.f32.mrb[20].mxu0  ;;  %v6055_v51 = vld [vmem:[#allocation2 + $0x68] sm:$0xff]  ;;  %v5488_v47 = vld [vmem:[%s6658_s3 + $0xe0] sm:$0xff]  }
 0x1e6   :  { %1731 = vst.msk [vmem:[#allocation2 + $0x70] sm:$0xff] %vm1716_vm2, %v1711_v48  ;;  %v1668_v53 = vadd.f32 %v4822_v50, %v6007_v38  ;;  %v1580_v54 = vpop.f32.mrb[21].mxu0  ;;  %4859 = vmatmul.mubr.msk.bf16.gmra.mrb[16].mxu1 %vm1716_vm2, %v6055_v51  ;;  %v6137_v34 = vld [vmem:[#allocation2 + $0x20] sm:$0xff]  ;;  %v5489_v48 = vld [vmem:[%s6658_s3 + $0xe8] sm:$0xff]  }
 0x1e7   :  { %1730 = vst.msk [vmem:[#allocation2 + $0x28] sm:$0xff] %vm1716_vm2, %v1710_v49  ;;  %v1666_v55 = vadd.f32 %v6007_v38, %v1580_v54  ;;  %v4823_v56 = vpop.f32.mrb[22].mxu0  ;;  %4862 = vmatprep.mubr.msk.bf16.mxu1 %vm5564_vm3, %v5562_v52  ;;  %v5490_v49 = vld [vmem:[%s6658_s3 + $0xf0] sm:$0xff]   ;;  %v5492_v50 = vld [vmem:[%s6658_s3 + $0x100] sm:$0xff]  }
 0x1e8   :  { %v1669_v57 = vadd.f32 %v4823_v56, %v6007_v38  ;;  %v1583_v58 = vpop.f32.mrb[23].mxu0  ;;  %v1696_v60 = vmax.f32 %v1668_v53, 0.0  ;;  %v5494_v53 = vld [vmem:[%s6658_s3 + $0x110] sm:$0xff]  }
 0x1e9   :  { %v1667_v59 = vadd.f32 %v6007_v38, %v1583_v58  ;;  %v1694_v62 = vmax.f32 %v1666_v55, 0.0 }
 0x1ea   :  { %v1697_v61 = vmax.f32 %v1669_v57, 0.0 }
 0x1eb   :  { %v1695_v63 = vmax.f32 %v1667_v59, 0.0 }
 0x1ec   :  { %v1713_v0 = vpack.c.bf16 %v1697_v61, %v1696_v60 }
 0x1ed   :  { %v1712_v1 = vpack.c.bf16 %v1695_v63, %v1694_v62  ;;  %v4826_v2 = vpop.f32.mrb[24].mxu0  ;;  %v6067_v3 = vld [vmem:[#allocation2 + $0x70] sm:$0xff] }
 0x1ee   :  { %1733 = vst.msk [vmem:[#allocation2 + $0x78] sm:$0xff] %vm1716_vm2, %v1713_v0  ;;  %v1672_v4 = vadd.f32 %v4826_v2, %v6007_v38  ;;  %v1596_v6 = vpop.f32.mrb[25].mxu0  ;;  %4863 = vmatmul.mubr.msk.bf16.gmra.mrb[20].mxu1 %vm1716_vm2, %v6067_v3  ;;  %v6143_v36 = vld [vmem:[#allocation2 + $0x28] sm:$0xff] }
 0x1ef   :  { %1732 = vst.msk [vmem:[#allocation2 + $0x30] sm:$0xff] %vm1716_vm2, %v1712_v1  ;;  %v1670_v7 = vadd.f32 %v6007_v38, %v1596_v6  ;;  %v4827_v8 = vpop.f32.mrb[26].mxu0  ;;  %4866 = vmatprep.mubr.msk.bf16.mxu1 %vm5564_vm3, %v5562_v52 }
 0x1f0   :  { %v1673_v9 = vadd.f32 %v4827_v8, %v6007_v38  ;;  %v1599_v10 = vpop.f32.mrb[27].mxu0  ;;  %v1700_v12 = vmax.f32 %v1672_v4, 0.0 }
 0x1f1   :  { %v1671_v11 = vadd.f32 %v6007_v38, %v1599_v10  ;;  %v1698_v14 = vmax.f32 %v1670_v7, 0.0  ;;  %v5474_v38 = vld [vmem:[%s6658_s3 + $0x70] sm:$0xff]  }
 0x1f2   :  { %v1701_v13 = vmax.f32 %v1673_v9, 0.0 }
 0x1f3   :  { %v1699_v15 = vmax.f32 %v1671_v11, 0.0 }
 0x1f4   :  { %v1715_v16 = vpack.c.bf16 %v1701_v13, %v1700_v12 }
 0x1f5   :  { %v1714_v17 = vpack.c.bf16 %v1699_v15, %v1698_v14  ;;  %v6079_v18 = vld [vmem:[#allocation2 + $0x78] sm:$0xff] }
 0x1f6   :  { %1735 = vst.msk [vmem:[#allocation2 + $0x80] sm:$0xff] %vm1716_vm2, %v1715_v16  ;;  %4867 = vmatmul.mubr.msk.bf16.gmra.mrb[24].mxu1 %vm1716_vm2, %v6079_v18  ;;  %v6149_v37 = vld [vmem:[#allocation2 + $0x30] sm:$0xff] }
 0x1f7   :  { %1734 = vst.msk [vmem:[#allocation2 + $0x38] sm:$0xff] %vm1716_vm2, %v1714_v17  ;;  %4884 = vmatprep.mubr.msk.bf16.mxu1 %vm5564_vm3, %v5562_v52 }
 0x1fe   :  { %4885 = vmatmul.mubr.msk.bf16.vlgmr.msra.gmra.mrb[28].mxu1 %vm1716_vm2, %v1736_v19  ;;  %v6206_v46 = vld [vmem:[#allocation2 + $0x38] sm:$0xff] }
 0x1ff   :  { %4913 = vmatpush3.bf16.msra.mxu1 %v5474_v38  ;;  %4888 = vmatprep.mubr.msk.bf16.mxu1 %vm5564_vm3, %v5562_v52 }
 0x200   :  { %4914 = vmatprep.subr.bf16.mxu1 %v5562_v52 }
 0x203   :  { %4915 = vmatpush3.bf16.msra.mxu1 %v5475_v21 }
 0x204   :  { %4916 = vmatprep.subr.bf16.mxu1 %v5562_v52 }
 0x206   :  { %4889 = vmatmul.mubr.msk.bf16.gmra.mrb[32].mxu1 %vm1716_vm2, %v1737_v23 }
 0x207   :  { %4892 = vmatprep.mubr.msk.bf16.mxu1 %vm5564_vm3, %v5562_v52  ;;  %4917 = vmatpush3.bf16.msra.mxu1 %v5476_v22 }
 0x208   :  { %4918 = vmatprep.subr.bf16.mxu1 %v5562_v52 }
 0x20b   :  { %4919 = vmatpush3.bf16.msra.mxu1 %v5477_v24 }
 0x20c   :  { %4920 = vmatprep.subr.bf16.mxu1 %v5562_v52 }
 0x20e   :  { %4893 = vmatmul.mubr.msk.bf16.gmra.mrb[36].mxu1 %vm1716_vm2, %v6112_v26 }
 0x20f   :  { %4896 = vmatprep.mubr.msk.bf16.mxu1 %vm5564_vm3, %v5562_v52  ;;  %4921 = vmatpush3.bf16.msra.mxu1 %v5478_v25 }
 0x210   :  { %4922 = vmatprep.subr.bf16.mxu1 %v5562_v52 }
 0x213   :  { %4923 = vmatpush3.bf16.msra.mxu1 %v5479_v27 }
 0x214   :  { %4924 = vmatprep.subr.bf16.mxu1 %v5562_v52 }
 0x216   :  { %4897 = vmatmul.mubr.msk.bf16.gmra.mrb[40].mxu1 %vm1716_vm2, %v6126_v29 }
 0x217   :  { %4900 = vmatprep.mubr.msk.bf16.mxu1 %vm5564_vm3, %v5562_v52  ;;  %4925 = vmatpush3.bf16.msra.mxu1 %v5480_v28 }
 0x218   :  { %4954 = vmatprep.subr.bf16.mxu1 %v5562_v52 }
 0x21e   :  { %4901 = vmatmul.mubr.msk.bf16.gmra.mrb[44].mxu1 %vm1716_vm2, %v6137_v34 }
 0x21f   :  { %4904 = vmatprep.mubr.msk.bf16.mxu1 %vm5564_vm3, %v5562_v52 }
 0x226   :  { %4905 = vmatmul.mubr.msk.bf16.gmra.mrb[48].mxu1 %vm1716_vm2, %v6143_v36 }
 0x227   :  { %4908 = vmatprep.mubr.msk.bf16.mxu1 %vm5564_vm3, %v5562_v52 }
 0x22e   :  { %4909 = vmatmul.mubr.msk.bf16.gmra.mrb[52].mxu1 %vm1716_vm2, %v6149_v37 }
 0x22f   :  { %4926 = vmatprep.mubr.msk.bf16.mxu1 %vm5564_vm3, %v5562_v52 }
 0x236   :  { %4927 = vmatmul.mubr.msk.bf16.vlgmr.msra.gmra.mrb[56].mxu1 %vm1716_vm2, %v1737_v23 }
 0x237   :  { %4955 = vmatpush3.bf16.msra.mxu1 %v5481_v39  ;;  %4930 = vmatprep.mubr.msk.bf16.mxu1 %vm5564_vm3, %v5562_v52 }
 0x238   :  { %4956 = vmatprep.subr.bf16.mxu1 %v5562_v52 }
 0x23b   :  { %4957 = vmatpush3.bf16.msra.mxu1 %v5482_v40 }
 0x23c   :  { %4958 = vmatprep.subr.bf16.mxu1 %v5562_v52 }
 0x23e   :  { %4931 = vmatmul.mubr.msk.bf16.gmra.mrb[60].mxu1 %vm1716_vm2, %v6112_v26 }
 0x23f   :  { %4934 = vmatprep.mubr.msk.bf16.mxu1 %vm5564_vm3, %v5562_v52  ;;  %4959 = vmatpush3.bf16.msra.mxu1 %v5483_v41 }
 0x240   :  { %4960 = vmatprep.subr.bf16.mxu1 %v5562_v52 }
 0x243   :  { %4961 = vmatpush3.bf16.msra.mxu1 %v5484_v42  ;;  %v5496_v42 = vld [vmem:[%s6660_s5 + $0x40] sm:$0xff]  }
 0x244   :  { %4962 = vmatprep.subr.bf16.mxu1 %v5562_v52  ;;  %5040 = vmatprep.subr.bf16.mxu0 %v5496_v42 }
 0x245   :  { %5041 = vmatpush3.bf16.msra.mxu0 %v5496_v42 }
 0x246   :  { %4935 = vmatmul.mubr.msk.bf16.gmra.mrb[64].mxu1 %vm1716_vm2, %v6126_v29 }
 0x247   :  { %4938 = vmatprep.mubr.msk.bf16.mxu1 %vm5564_vm3, %v5562_v52  ;;  %4963 = vmatpush3.bf16.msra.mxu1 %v5485_v43 }
 0x248   :  { %4964 = vmatprep.subr.bf16.mxu1 %v5562_v52 }
 0x24b   :  { %4965 = vmatpush3.bf16.msra.mxu1 %v5486_v44 }
 0x24c   :  { %4966 = vmatprep.subr.bf16.mxu1 %v5562_v52 }
 0x24e   :  { %4939 = vmatmul.mubr.msk.bf16.gmra.mrb[68].mxu1 %vm1716_vm2, %v6137_v34 }
 0x24f   :  { %4942 = vmatprep.mubr.msk.bf16.mxu1 %vm5564_vm3, %v5562_v52  ;;  %4967 = vmatpush3.bf16.msra.mxu1 %v5487_v45 }
 0x250   :  { %4996 = vmatprep.subr.bf16.mxu1 %v5562_v52 }
 0x256   :  { %4943 = vmatmul.mubr.msk.bf16.gmra.mrb[72].mxu1 %vm1716_vm2, %v6143_v36 }
 0x257   :  { %4946 = vmatprep.mubr.msk.bf16.mxu1 %vm5564_vm3, %v5562_v52 }
 0x25e   :  { %4947 = vmatmul.mubr.msk.bf16.gmra.mrb[76].mxu1 %vm1716_vm2, %v6149_v37 }
 0x25f   :  { %4950 = vmatprep.mubr.msk.bf16.mxu1 %vm5564_vm3, %v5562_v52 }
 0x266   :  { %4951 = vmatmul.mubr.msk.bf16.gmra.mrb[80].mxu1 %vm1716_vm2, %v6206_v46 }
 0x267   :  { %4968 = vmatprep.mubr.msk.bf16.mxu1 %vm5564_vm3, %v5562_v52 }
 0x26e   :  { %4969 = vmatmul.mubr.msk.bf16.vlgmr.msra.gmra.mrb[84].mxu1 %vm1716_vm2, %v6019_v5  ;;  %v5491_v5 = vld [vmem:[%s6658_s3 + $0xf8] sm:$0xff]  }
 0x26f   :  { %4997 = vmatpush3.bf16.msra.mxu1 %v5488_v47  ;;  %4972 = vmatprep.mubr.msk.bf16.mxu1 %vm5564_vm3, %v5562_v52 }
 0x270   :  { %4998 = vmatprep.subr.bf16.mxu1 %v5562_v52 }
 0x273   :  { %4999 = vmatpush3.bf16.msra.mxu1 %v5489_v48 }
 0x274   :  { %5000 = vmatprep.subr.bf16.mxu1 %v5562_v52 }
 0x276   :  { %4973 = vmatmul.mubr.msk.bf16.gmra.mrb[88].mxu1 %vm1716_vm2, %v6031_v20  ;;  %v5493_v20 = vld [vmem:[%s6658_s3 + $0x108] sm:$0xff]  }
 0x277   :  { %4976 = vmatprep.mubr.msk.bf16.mxu1 %vm5564_vm3, %v5562_v52  ;;  %5001 = vmatpush3.bf16.msra.mxu1 %v5490_v49  ;;  %v5497_v49 = vld [vmem:[%s6660_s5 + $0x48] sm:$0xff]  }
 0x278   :  { %5002 = vmatprep.subr.bf16.mxu1 %v5562_v52  ;;  %5042 = vmatprep.subr.bf16.mxu0 %v5497_v49 }
 0x279   :  { %5043 = vmatpush3.bf16.msra.mxu0 %v5497_v49 }
 0x27b   :  { %5003 = vmatpush3.bf16.msra.mxu1 %v5491_v5 }
 0x27c   :  { %5004 = vmatprep.subr.bf16.mxu1 %v5562_v52 }
 0x27e   :  { %4977 = vmatmul.mubr.msk.bf16.gmra.mrb[92].mxu1 %vm1716_vm2, %v6043_v35  ;;  %v2277_v35 = vld [vmem:[#allocation2 + $0x80] sm:$0xff] }
 0x27f   :  { %4980 = vmatprep.mubr.msk.bf16.mxu1 %vm5564_vm3, %v5562_v52  ;;  %5005 = vmatpush3.bf16.msra.mxu1 %v5492_v50 }
 0x280   :  { %5006 = vmatprep.subr.bf16.mxu1 %v5562_v52 }
 0x283   :  { %5007 = vmatpush3.bf16.msra.mxu1 %v5493_v20 }
 0x284   :  { %5008 = vmatprep.subr.bf16.mxu1 %v5562_v52 }
 0x286   :  { %4981 = vmatmul.mubr.msk.bf16.gmra.mrb[96].mxu1 %vm1716_vm2, %v6055_v51 }
 0x287   :  { %4984 = vmatprep.mubr.msk.bf16.mxu1 %vm5564_vm3, %v5562_v52  ;;  %5009 = vmatpush3.bf16.msra.mxu1 %v5494_v53 }
 0x288   :  { %5148 = vmatprep.subr.bf16.mxu1 %v5562_v52 }
 0x28e   :  { %4985 = vmatmul.mubr.msk.bf16.gmra.mrb[100].mxu1 %vm1716_vm2, %v6067_v3 }
 0x28f   :  { %4988 = vmatprep.mubr.msk.bf16.mxu1 %vm5564_vm3, %v5562_v52 }
 0x296   :  { %4989 = vmatmul.mubr.msk.bf16.gmra.mrb[104].mxu1 %vm1716_vm2, %v6079_v18  ;;  %v2465_v18 = vld [vmem:[#allocation2 + $0x40] sm:$0xff] }
 0x297   :  { %4992 = vmatprep.mubr.msk.bf16.mxu1 %vm5564_vm3, %v5562_v52 }
 0x29e   :  { %4993 = vmatmul.mubr.msk.bf16.gmra.mrb[108].mxu1 %vm1716_vm2, %v2277_v35 }
 0x29f   :  { %5010 = vmatprep.mubr.msk.bf16.mxu1 %vm5564_vm3, %v5562_v52 }
 0x2a1   :  { %v1884_v51 = vpop.f32.mrb[4].mxu1 }
 0x2a2   :  { %v4848_v54 = vpop.f32.mrb[5].mxu1 }
 0x2a3   :  { %v1887_v55 = vpop.f32.mrb[6].mxu1 }
 0x2a4   :  { %v4849_v56 = vpop.f32.mrb[7].mxu1 }
 0x2a6   :  { %5011 = vmatmul.mubr.msk.bf16.vlgmr.msra.gmra.mrb[112].mxu1 %vm1716_vm2, %v6112_v26 }
 0x2a7   :  { %5014 = vmatprep.mubr.msk.bf16.mxu1 %vm5564_vm3, %v5562_v52 }
 0x2a9   :  { %v1892_v57 = vpop.f32.mrb[8].mxu1 }
 0x2aa   :  { %v4852_v58 = vpop.f32.mrb[9].mxu1 }
 0x2ab   :  { %v1895_v59 = vpop.f32.mrb[10].mxu1 }
 0x2ac   :  { %v4853_v60 = vpop.f32.mrb[11].mxu1 }
 0x2ae   :  { %5015 = vmatmul.mubr.msk.bf16.gmra.mrb[116].mxu1 %vm1716_vm2, %v6126_v29 }
 0x2af   :  { %5018 = vmatprep.mubr.msk.bf16.mxu1 %vm5564_vm3, %v5562_v52 }
 0x2b1   :  { %v1900_v61 = vpop.f32.mrb[12].mxu1 }
 0x2b2   :  { %v4856_v62 = vpop.f32.mrb[13].mxu1 }
 0x2b3   :  { %v1903_v63 = vpop.f32.mrb[14].mxu1 }
 0x2b4   :  { %v4857_v0 = vpop.f32.mrb[15].mxu1 }
 0x2b6   :  { %5019 = vmatmul.mubr.msk.bf16.gmra.mrb[120].mxu1 %vm1716_vm2, %v6137_v34 }
 0x2b7   :  { %5022 = vmatprep.mubr.msk.bf16.mxu1 %vm5564_vm3, %v5562_v52 }
 0x2b9   :  { %v1908_v1 = vpop.f32.mrb[16].mxu1 }
 0x2ba   :  { %v4860_v2 = vpop.f32.mrb[17].mxu1 }
 0x2bb   :  { %v1911_v3 = vpop.f32.mrb[18].mxu1 }
 0x2bc   :  { %v4861_v4 = vpop.f32.mrb[19].mxu1 }
 0x2be   :  { %5023 = vmatmul.mubr.msk.bf16.gmra.mrb[124].mxu1 %vm1716_vm2, %v6143_v36 }
 0x2bf   :  { %5026 = vmatprep.mubr.msk.bf16.mxu1 %vm5564_vm3, %v5562_v52 }
 0x2c1   :  { %v1916_v6 = vpop.f32.mrb[20].mxu1 }
 0x2c2   :  { %v4864_v7 = vpop.f32.mrb[21].mxu1 }
 0x2c3   :  { %v1919_v8 = vpop.f32.mrb[22].mxu1 }
 0x2c4   :  { %v4865_v9 = vpop.f32.mrb[23].mxu1 }
 0x2c6   :  { %5027 = vmatmul.mubr.msk.bf16.gmra.mrb[128].mxu1 %vm1716_vm2, %v6149_v37 }
 0x2c7   :  { %5030 = vmatprep.mubr.msk.bf16.mxu1 %vm5564_vm3, %v5562_v52 }
 0x2c9   :  { %v1924_v10 = vpop.f32.mrb[24].mxu1 }
 0x2ca   :  { %v4868_v11 = vpop.f32.mrb[25].mxu1 }
 0x2cb   :  { %v1927_v12 = vpop.f32.mrb[26].mxu1 }
 0x2cc   :  { %v4869_v13 = vpop.f32.mrb[27].mxu1 }
 0x2ce   :  { %5031 = vmatmul.mubr.msk.bf16.gmra.mrb[132].mxu1 %vm1716_vm2, %v6206_v46 }
 0x2cf   :  { %5034 = vmatprep.mubr.msk.bf16.mxu1 %vm5564_vm3, %v5562_v52 }
 0x2d1   :  { %v2028_v14 = vpop.f32.mrb[28].mxu1 }
 0x2d2   :  { %v2029_v15 = vadd.f32 %v2028_v14, %v6130_v30  ;;  %v4886_v16 = vpop.f32.mrb[29].mxu1 }
 0x2d3   :  { %v2031_v17 = vpop.f32.mrb[30].mxu1 }
 0x2d4   :  { %v2032_v19 = vadd.f32 %v2031_v17, %v6135_v32  ;;  %v4887_v38 = vpop.f32.mrb[31].mxu1 }
 0x2d5   :  { %v6337_v38 = vld [vmem:[%s6660_s5] sm:$0xff]  }
 0x2d6   :  { %5035 = vmatmul.mubr.msk.bf16.gmra.mrb[136].mxu1 %vm1716_vm2, %v2465_v18 }
 0x2d7   :  { %5164 = vmatprep.mubr.msk.bf16.mxu1 %vm5564_vm3, %v5562_v52 }
 0x2d9   :  { %v2036_v21 = vpop.f32.mrb[32].mxu1 }
 0x2da   :  { %v6296_v22 = vadd.f32 %v2036_v21, %v1884_v51  ;;  %v4890_v23 = vpop.f32.mrb[33].mxu1 }
 0x2db   :  { %v2039_v24 = vpop.f32.mrb[34].mxu1 }
 0x2dc   :  { %v6298_v25 = vadd.f32 %v2039_v24, %v1887_v55  ;;  %v4891_v26 = vpop.f32.mrb[35].mxu1 }
 0x2e1   :  { %v2044_v27 = vpop.f32.mrb[36].mxu1 }
 0x2e2   :  { %v6300_v28 = vadd.f32 %v2044_v27, %v1892_v57  ;;  %v4894_v29 = vpop.f32.mrb[37].mxu1  ;;  %v5498_v57 = vld [vmem:[%s6660_s5 + $0x50] sm:$0xff]  }
 0x2e3   :  { %v2047_v30 = vpop.f32.mrb[38].mxu1  ;;  %5044 = vmatprep.subr.bf16.mxu0 %v5498_v57 }
 0x2e4   :  { %v6302_v31 = vadd.f32 %v2047_v30, %v1895_v59  ;;  %v4895_v32 = vpop.f32.mrb[39].mxu1  ;;  %5045 = vmatpush3.bf16.msra.mxu0 %v5498_v57 }
 0x2e9   :  { %v2052_v34 = vpop.f32.mrb[40].mxu1 }
 0x2ea   :  { %v6307_v36 = vadd.f32 %v2052_v34, %v1900_v61  ;;  %v4898_v37 = vpop.f32.mrb[41].mxu1  ;;  %v5499_v61 = vld [vmem:[%s6660_s5 + $0x58] sm:$0xff]  }
 0x2eb   :  { %v2055_v39 = vpop.f32.mrb[42].mxu1  ;;  %5046 = vmatprep.subr.bf16.mxu0 %v5499_v61 }
 0x2ec   :  { %v6309_v40 = vadd.f32 %v2055_v39, %v1903_v63  ;;  %v4899_v41 = vpop.f32.mrb[43].mxu1  ;;  %5047 = vmatpush3.bf16.msra.mxu0 %v5499_v61 }
 0x2f1   :  { %v2060_v43 = vpop.f32.mrb[44].mxu1 }
 0x2f2   :  { %v2061_v44 = vadd.f32 %v2060_v43, %v1908_v1  ;;  %v4902_v45 = vpop.f32.mrb[45].mxu1  ;;  %v5500_v1 = vld [vmem:[%s6660_s5 + $0x60] sm:$0xff]  }
 0x2f3   :  { %v2063_v46 = vpop.f32.mrb[46].mxu1  ;;  %5048 = vmatprep.subr.bf16.mxu0 %v5500_v1 }
 0x2f4   :  { %v2064_v47 = vadd.f32 %v2063_v46, %v1911_v3  ;;  %v4903_v48 = vpop.f32.mrb[47].mxu1  ;;  %5049 = vmatpush3.bf16.msra.mxu0 %v5500_v1 }
 0x2f9   :  { %v2068_v5 = vpop.f32.mrb[48].mxu1 }
 0x2fa   :  { %v2069_v50 = vadd.f32 %v2068_v5, %v1916_v6  ;;  %v4906_v20 = vpop.f32.mrb[49].mxu1  ;;  %v5501_v6 = vld [vmem:[%s6660_s5 + $0x68] sm:$0xff]  }
 0x2fb   :  { %v2071_v53 = vpop.f32.mrb[50].mxu1  ;;  %5050 = vmatprep.subr.bf16.mxu0 %v5501_v6 }
 0x2fc   :  { %v2072_v35 = vadd.f32 %v2071_v53, %v1919_v8  ;;  %v4907_v51 = vpop.f32.mrb[51].mxu1  ;;  %5051 = vmatpush3.bf16.msra.mxu0 %v5501_v6 }
 0x2fd   :  { %5060 = vmatprep.subr.bf16.mxu0 %v6337_v38 }
 0x301   :  { %v2076_v54 = vpop.f32.mrb[52].mxu1 }
 0x302   :  { %v2077_v55 = vadd.f32 %v2076_v54, %v1924_v10  ;;  %v4910_v56 = vpop.f32.mrb[53].mxu1  ;;  %v2719_v10 = vld [vmem:[#allocation3 + $0x30] sm:$0xff] }
 0x303   :  { %v2079_v58 = vpop.f32.mrb[54].mxu1  ;;  %5052 = vmatprep.mubr.msk.bf16.mxu0 %vm1716_vm2, %v2719_v10 }
 0x304   :  { %v2080_v59 = vadd.f32 %v2079_v58, %v1927_v12  ;;  %v4911_v60 = vpop.f32.mrb[55].mxu1 }
 0x309   :  { %v2202_v62 = vpop.f32.mrb[56].mxu1 }
 0x30a   :  { %v2257_v63 = vadd.f32 %v2202_v62, %v2029_v15  ;;  %v4928_v0 = vpop.f32.mrb[57].mxu1 }
 0x30b   :  { %v2205_v2 = vpop.f32.mrb[58].mxu1 }
 0x30c   :  { %v2258_v3 = vadd.f32 %v2205_v2, %v2032_v19  ;;  %v4929_v4 = vpop.f32.mrb[59].mxu1 }
 0x311   :  { %v2210_v7 = vpop.f32.mrb[60].mxu1 }
 0x312   :  { %v2259_v8 = vadd.f32 %v2210_v7, %v6296_v22  ;;  %v4932_v9 = vpop.f32.mrb[61].mxu1 }
 0x313   :  { %v2213_v11 = vpop.f32.mrb[62].mxu1 }
 0x314   :  { %v2260_v12 = vadd.f32 %v2213_v11, %v6298_v25  ;;  %v4933_v13 = vpop.f32.mrb[63].mxu1 }
 0x319   :  { %v2218_v14 = vpop.f32.mrb[64].mxu1 }
 0x31a   :  { %v2261_v15 = vadd.f32 %v2218_v14, %v6300_v28  ;;  %v4936_v16 = vpop.f32.mrb[65].mxu1 }
 0x31b   :  { %v2221_v17 = vpop.f32.mrb[66].mxu1 }
 0x31c   :  { %v2262_v18 = vadd.f32 %v2221_v17, %v6302_v31  ;;  %v4937_v19 = vpop.f32.mrb[67].mxu1 }
 0x321   :  { %v2226_v21 = vpop.f32.mrb[68].mxu1 }
 0x322   :  { %v2263_v22 = vadd.f32 %v2226_v21, %v6307_v36  ;;  %v4940_v23 = vpop.f32.mrb[69].mxu1 }
 0x323   :  { %v2229_v24 = vpop.f32.mrb[70].mxu1 }
 0x324   :  { %v2264_v25 = vadd.f32 %v2229_v24, %v6309_v40  ;;  %v4941_v26 = vpop.f32.mrb[71].mxu1 }
 0x325   :  { %v6359_v26 = vld [vmem:[%s6661_s4] ss:$0 sm:$0xff] }
 0x329   :  { %v2234_v27 = vpop.f32.mrb[72].mxu1 }
 0x32a   :  { %v2265_v28 = vadd.f32 %v2234_v27, %v2061_v44  ;;  %v4944_v29 = vpop.f32.mrb[73].mxu1 }
 0x32b   :  { %v2237_v30 = vpop.f32.mrb[74].mxu1 }
 0x32c   :  { %v2266_v31 = vadd.f32 %v2237_v30, %v2064_v47  ;;  %v4945_v32 = vpop.f32.mrb[75].mxu1 }
 0x331   :  { %v2242_v33 = vpop.f32.mrb[76].mxu1 }
 0x332   :  { %v2267_v34 = vadd.f32 %v2242_v33, %v2069_v50  ;;  %v4948_v37 = vpop.f32.mrb[77].mxu1 }
 0x333   :  { %v2245_v39 = vpop.f32.mrb[78].mxu1 }
 0x334   :  { %v2268_v41 = vadd.f32 %v2245_v39, %v2072_v35  ;;  %v4949_v42 = vpop.f32.mrb[79].mxu1 }
 0x339   :  { %v2250_v43 = vpop.f32.mrb[80].mxu1 }
 0x33a   :  { %v2269_v45 = vadd.f32 %v2250_v43, %v2077_v55  ;;  %v4952_v36 = vpop.f32.mrb[81].mxu1 }
 0x33b   :  { %v2253_v46 = vpop.f32.mrb[82].mxu1 }
 0x33c   :  { %v2270_v48 = vadd.f32 %v2253_v46, %v2080_v59  ;;  %v4953_v49 = vpop.f32.mrb[83].mxu1 }
 0x341   :  { %v2390_v40 = vpop.f32.mrb[84].mxu1 }
 0x342   :  { %v2445_v5 = vadd.f32 %v2390_v40, %v2257_v63  ;;  %v4970_v20 = vpop.f32.mrb[85].mxu1 }
 0x343   :  { %v2393_v44 = vpop.f32.mrb[86].mxu1 }
 0x344   :  { %v2446_v53 = vadd.f32 %v2393_v44, %v2258_v3  ;;  %v4971_v51 = vpop.f32.mrb[87].mxu1 }
 0x349   :  { %v2398_v47 = vpop.f32.mrb[88].mxu1 }
 0x34a   :  { %v2447_v54 = vadd.f32 %v2398_v47, %v2259_v8  ;;  %v4974_v56 = vpop.f32.mrb[89].mxu1 }
 0x34b   :  { %v2401_v50 = vpop.f32.mrb[90].mxu1 }
 0x34c   :  { %v2448_v57 = vadd.f32 %v2401_v50, %v2260_v12  ;;  %v4975_v58 = vpop.f32.mrb[91].mxu1 }
 0x351   :  { %v2406_v35 = vpop.f32.mrb[92].mxu1 }
 0x352   :  { %v2449_v60 = vadd.f32 %v2406_v35, %v2261_v15  ;;  %v4978_v61 = vpop.f32.mrb[93].mxu1 }
 0x353   :  { %v2409_v55 = vpop.f32.mrb[94].mxu1 }
 0x354   :  { %v2450_v62 = vadd.f32 %v2409_v55, %v2262_v18  ;;  %v4979_v0 = vpop.f32.mrb[95].mxu1 }
 0x359   :  { %v2414_v59 = vpop.f32.mrb[96].mxu1 }
 0x35a   :  { %v2451_v1 = vadd.f32 %v2414_v59, %v2263_v22  ;;  %v4982_v2 = vpop.f32.mrb[97].mxu1 }
 0x35b   :  { %v2417_v63 = vpop.f32.mrb[98].mxu1 }
 0x35c   :  { %v6342_v4 = vadd.f32 %v2417_v63, %v2264_v25  ;;  %v4983_v3 = vpop.f32.mrb[99].mxu1 }
 0x361   :  { %v2422_v6 = vpop.f32.mrb[100].mxu1 }
 0x362   :  { %v6344_v7 = vadd.f32 %v2422_v6, %v2265_v28  ;;  %v4986_v8 = vpop.f32.mrb[101].mxu1 }
 0x363   :  { %v2425_v9 = vpop.f32.mrb[102].mxu1  ;;  %v5504_v8 = vld [vmem:[%s6660_s5 + $0x10] sm:$0xff]  }
 0x364   :  { %v6346_v10 = vadd.f32 %v2425_v9, %v2266_v31  ;;  %v4987_v11 = vpop.f32.mrb[103].mxu1 }
 0x369   :  { %v2430_v12 = vpop.f32.mrb[104].mxu1 }
 0x36a   :  { %v6348_v13 = vadd.f32 %v2430_v12, %v2267_v34  ;;  %v4990_v14 = vpop.f32.mrb[105].mxu1 }
 0x36b   :  { %v2433_v15 = vpop.f32.mrb[106].mxu1 }
 0x36c   :  { %v6350_v16 = vadd.f32 %v2433_v15, %v2268_v41  ;;  %v4991_v17 = vpop.f32.mrb[107].mxu1 }
 0x371   :  { %v2438_v18 = vpop.f32.mrb[108].mxu1 }
 0x372   :  { %v6352_v19 = vadd.f32 %v2438_v18, %v2269_v45  ;;  %v4994_v21 = vpop.f32.mrb[109].mxu1 }
 0x373   :  { %v2441_v22 = vpop.f32.mrb[110].mxu1  ;;  %v5531_v21 = vld [vmem:[%s6662_s7 + $0x48] sm:$0xff]  }
 0x374   :  { %v6354_v23 = vadd.f32 %v2441_v22, %v2270_v48  ;;  %v4995_v24 = vpop.f32.mrb[111].mxu1 }
 0x379   :  { %v2578_v25 = vpop.f32.mrb[112].mxu1 }
 0x37a   :  { %v2633_v27 = vadd.f32 %v2578_v25, %v2445_v5  ;;  %v5012_v28 = vpop.f32.mrb[113].mxu1 }
 0x37b   :  { %v2581_v29 = vpop.f32.mrb[114].mxu1  ;;  %v5532_v28 = vld [vmem:[%s6662_s7 + $0x50] sm:$0xff]  }
 0x37c   :  { %v2654_v30 = vadd.f32 %v6359_v26, %v2633_v27  ;;  %v2634_v31 = vadd.f32 %v2581_v29, %v2446_v53  ;;  %v5013_v32 = vpop.f32.mrb[115].mxu1  ;;  %v5506_v27 = vld [vmem:[%s6660_s5 + $0x20] sm:$0xff]  }
 0x37e   :  { %v2655_v33 = vadd.f32 %v6359_v26, %v2634_v31  ;;  %v2668_v34 = vmax.f32 %v2654_v30, 0.0  ;;  %v5507_v31 = vld [vmem:[%s6660_s5 + $0x28] sm:$0xff]  }
 0x380   :  { %v2669_v37 = vmax.f32 %v2655_v33, 0.0 }
 0x381   :  { %v2586_v39 = vpop.f32.mrb[116].mxu1 }
 0x382   :  { %v2682_v41 = vpack.c.bf16 %v2669_v37, %v2668_v34  ;;  %v2635_v42 = vadd.f32 %v2586_v39, %v2447_v54  ;;  %v5016_v43 = vpop.f32.mrb[117].mxu1  ;;  %v5533_v37 = vld [vmem:[%s6662_s7 + $0x58] sm:$0xff]  }
 0x383   :  { %v2589_v45 = vpop.f32.mrb[118].mxu1 }
 0x384   :  { %2694 = vst.msk [vmem:[#allocation3 + $0x8] sm:$0xff] %vm1716_vm2, %v2682_v41  ;;  %v2656_v36 = vadd.f32 %v6359_v26, %v2635_v42  ;;  %v2636_v46 = vadd.f32 %v2589_v45, %v2448_v57  ;;  %v5017_v48 = vpop.f32.mrb[119].mxu1 }
 0x386   :  { %v2657_v49 = vadd.f32 %v6359_v26, %v2636_v46  ;;  %v2670_v40 = vmax.f32 %v2656_v36, 0.0  ;;  %v5534_v46 = vld [vmem:[%s6662_s7 + $0x60] sm:$0xff]  }
 0x388   :  { %v2671_v5 = vmax.f32 %v2657_v49, 0.0 }
 0x389   :  { %v2594_v20 = vpop.f32.mrb[120].mxu1 }
 0x38a   :  { %v2683_v44 = vpack.c.bf16 %v2671_v5, %v2670_v40  ;;  %v2637_v53 = vadd.f32 %v2594_v20, %v2449_v60  ;;  %v5020_v51 = vpop.f32.mrb[121].mxu1  ;;  %v5503_v60 = vld [vmem:[%s6660_s5 + $0x8] sm:$0xff]  }
 0x38b   :  { %v2597_v47 = vpop.f32.mrb[122].mxu1  ;;  %v5535_v51 = vld [vmem:[%s6662_s7 + $0x68] sm:$0xff]  }
 0x38c   :  { %2695 = vst.msk [vmem:[#allocation3 + $0x38] sm:$0xff] %vm1716_vm2, %v2683_v44  ;;  %v2658_v54 = vadd.f32 %v6359_v26, %v2637_v53  ;;  %v2638_v56 = vadd.f32 %v2597_v47, %v2450_v62  ;;  %v5021_v50 = vpop.f32.mrb[123].mxu1  ;;  %v5509_v44 = vld [vmem:[%s6660_s5 + $0x70] sm:$0xff]  }
 0x38d   :  { %v5536_v50 = vld [vmem:[%s6662_s7 + $0x70] sm:$0xff]  }
 0x38e   :  { %v2659_v58 = vadd.f32 %v6359_v26, %v2638_v56  ;;  %v2672_v35 = vmax.f32 %v2658_v54, 0.0 }
 0x390   :  { %v2673_v57 = vmax.f32 %v2659_v58, 0.0 }
 0x391   :  { %v2602_v61 = vpop.f32.mrb[124].mxu1 }
 0x392   :  { %v2684_v55 = vpack.c.bf16 %v2673_v57, %v2672_v35  ;;  %v2639_v0 = vadd.f32 %v2602_v61, %v2451_v1  ;;  %v5024_v59 = vpop.f32.mrb[125].mxu1  ;;  %v2701_v57 = vld [vmem:[#allocation3] sm:$0xff] }
 0x393   :  { %v2605_v2 = vpop.f32.mrb[126].mxu1  ;;  %v6372_v63 = vld [vmem:[#allocation3 + $0x38] sm:$0xff]  ;;  %v5511_v59 = vld [vmem:[%s6660_s5 + $0x80] sm:$0xff]  }
 0x394   :  { %2696 = vst.msk [vmem:[#allocation3 + $0x10] sm:$0xff] %vm1716_vm2, %v2684_v55  ;;  %v2660_v62 = vadd.f32 %v6359_v26, %v2639_v0  ;;  %v2640_v3 = vadd.f32 %v2605_v2, %v6342_v4  ;;  %v5025_v6 = vpop.f32.mrb[127].mxu1  ;;  %5053 = vmatmul.mubr.msk.bf16.vlgmr.msra.gmra.mrb[28].mxu0 %vm1716_vm2, %v6372_v63  ;;  %v5530_v4 = vld [vmem:[%s6662_s7 + $0x40] sm:$0xff]  }
 0x395   :  { %5061 = vmatpush3.bf16.msra.mxu0 %v6337_v38  ;;  %v5505_v38 = vld [vmem:[%s6660_s5 + $0x18] sm:$0xff]   ;;  %5149 = vmatpush3.bf16.msra.mxu1 %v5530_v4  ;;  %v5515_v6 = vld [vmem:[%s6660_s5 + $0xa0] sm:$0xff]   ;;  %v5520_v4 = vld [vmem:[%s6660_s5 + $0xc8] sm:$0xff]  }
 0x396   :  { %v2661_v1 = vadd.f32 %v6359_v26, %v2640_v3  ;;  %5062 = vmatprep.subr.bf16.mxu0 %v5503_v60  ;;  %v2674_v9 = vmax.f32 %v2660_v62, 0.0  ;;  %5150 = vmatprep.subr.bf16.mxu1 %v5562_v52  ;;  %v5513_v62 = vld [vmem:[%s6660_s5 + $0x90] sm:$0xff]   ;;  %v5514_v3 = vld [vmem:[%s6660_s5 + $0x98] sm:$0xff]  }
 0x398   :  { %v2675_v11 = vmax.f32 %v2661_v1, 0.0  ;;  %v5516_v1 = vld [vmem:[%s6660_s5 + $0xa8] sm:$0xff]  }
 0x399   :  { %v2610_v12 = vpop.f32.mrb[128].mxu1  ;;  %5063 = vmatpush3.bf16.msra.mxu0 %v5503_v60  ;;  %5151 = vmatpush3.bf16.msra.mxu1 %v5531_v21  ;;  %v5512_v60 = vld [vmem:[%s6660_s5 + $0x88] sm:$0xff]   ;;  %v5526_v21 = vld [vmem:[%s6660_s5 + $0xf8] sm:$0xff]  }
 0x39a   :  { %v2685_v14 = vpack.c.bf16 %v2675_v11, %v2674_v9  ;;  %v2641_v15 = vadd.f32 %v2610_v12, %v6344_v7  ;;  %v5028_v17 = vpop.f32.mrb[129].mxu1  ;;  %5064 = vmatprep.subr.bf16.mxu0 %v5504_v8  ;;  %5152 = vmatprep.subr.bf16.mxu1 %v5562_v52  ;;  %v5518_v9 = vld [vmem:[%s6660_s5 + $0xb8] sm:$0xff]   ;;  %v5519_v11 = vld [vmem:[%s6660_s5 + $0xc0] sm:$0xff]  }
 0x39b   :  { %v2613_v18 = vpop.f32.mrb[130].mxu1  ;;  %v6453_v0 = vld [vmem:[#allocation3 + $0x10] sm:$0xff]  ;;  %v5524_v17 = vld [vmem:[%s6660_s5 + $0xe8] sm:$0xff]  }
 0x39c   :  { %2697 = vst.msk [vmem:[#allocation3 + $0x40] sm:$0xff] %vm1716_vm2, %v2685_v14  ;;  %v2662_v22 = vadd.f32 %v6359_v26, %v2641_v15  ;;  %v2642_v24 = vadd.f32 %v2613_v18, %v6346_v10  ;;  %v5029_v25 = vpop.f32.mrb[131].mxu1  ;;  %v5521_v14 = vld [vmem:[%s6660_s5 + $0xd0] sm:$0xff]   ;;  %v5522_v15 = vld [vmem:[%s6660_s5 + $0xd8] sm:$0xff]   ;;  %v3125_v18 = vld [vmem:[#allocation3 + $0x50] sm:$0xff] }
 0x39d   :  { %5065 = vmatpush3.bf16.msra.mxu0 %v5504_v8  ;;  %5153 = vmatpush3.bf16.msra.mxu1 %v5532_v28  ;;  %v5517_v8 = vld [vmem:[%s6660_s5 + $0xb0] sm:$0xff]   ;;  %v4345_v28 = vld [vmem:[%s6663_s6] ss:$0 sm:$0xff] }
 0x39e   :  { %v2663_v7 = vadd.f32 %v6359_v26, %v2642_v24  ;;  %5066 = vmatprep.subr.bf16.mxu0 %v5505_v38  ;;  %v2676_v29 = vmax.f32 %v2662_v22, 0.0  ;;  %5154 = vmatprep.subr.bf16.mxu1 %v5562_v52  ;;  %v5527_v22 = vld [vmem:[%s6660_s5 + $0x100] sm:$0xff]   ;;  %v5528_v24 = vld [vmem:[%s6660_s5 + $0x108] sm:$0xff]   ;;  %v5529_v25 = vld [vmem:[%s6660_s5 + $0x110] sm:$0xff]  }
 0x3a0   :  { %v2677_v30 = vmax.f32 %v2663_v7, 0.0  ;;  %v3271_v7 = vld [vmem:[#allocation3 + $0x28] sm:$0xff] }
 0x3a1   :  { %v2618_v10 = vpop.f32.mrb[132].mxu1  ;;  %5067 = vmatpush3.bf16.msra.mxu0 %v5505_v38  ;;  %5155 = vmatpush3.bf16.msra.mxu1 %v5533_v37  ;;  %v5525_v38 = vld [vmem:[%s6660_s5 + $0xf0] sm:$0xff]  }
 0x3a2   :  { %v2686_v32 = vpack.c.bf16 %v2677_v30, %v2676_v29  ;;  %v2643_v33 = vadd.f32 %v2618_v10, %v6348_v13  ;;  %v5032_v34 = vpop.f32.mrb[133].mxu1  ;;  %5068 = vmatprep.subr.bf16.mxu0 %v5506_v27  ;;  %v5508_v13 = vld [vmem:[%s6660_s5 + $0x30] sm:$0xff]   ;;  %5156 = vmatprep.subr.bf16.mxu1 %v5562_v52 }
 0x3a3   :  { %v2621_v39 = vpop.f32.mrb[134].mxu1  ;;  %v6413_v41 = vld [vmem:[#allocation3 + $0x40] sm:$0xff] }
 0x3a4   :  { %2698 = vst.msk [vmem:[#allocation3 + $0x18] sm:$0xff] %vm1716_vm2, %v2686_v32  ;;  %v2664_v42 = vadd.f32 %v6359_v26, %v2643_v33  ;;  %v2644_v43 = vadd.f32 %v2621_v39, %v6350_v16  ;;  %v5033_v45 = vpop.f32.mrb[135].mxu1  ;;  %5056 = vmatprep.mubr.msk.bf16.mxu0 %vm1716_vm2, %v6413_v41 }
 0x3a5   :  { %5069 = vmatpush3.bf16.msra.mxu0 %v5506_v27  ;;  %5157 = vmatpush3.bf16.msra.mxu1 %v5534_v46  ;;  %v5537_v27 = vld [vmem:[%s6662_s7 + $0x78] sm:$0xff]   ;;  %v5538_v45 = vld [vmem:[%s6662_s7] sm:$0xff]  }
 0x3a6   :  { %v2665_v36 = vadd.f32 %v6359_v26, %v2644_v43  ;;  %5070 = vmatprep.subr.bf16.mxu0 %v5507_v31  ;;  %v2678_v16 = vmax.f32 %v2664_v42, 0.0  ;;  %5158 = vmatprep.subr.bf16.mxu1 %v5562_v52 }
 0x3a8   :  { %v2679_v48 = vmax.f32 %v2665_v36, 0.0 }
 0x3a9   :  { %v2626_v49 = vpop.f32.mrb[136].mxu1  ;;  %5071 = vmatpush3.bf16.msra.mxu0 %v5507_v31  ;;  %5159 = vmatpush3.bf16.msra.mxu1 %v5535_v51 }
 0x3aa   :  { %v2687_v40 = vpack.c.bf16 %v2679_v48, %v2678_v16  ;;  %v2645_v5 = vadd.f32 %v2626_v49, %v6352_v19  ;;  %v5036_v20 = vpop.f32.mrb[137].mxu1  ;;  %5072 = vmatprep.subr.bf16.mxu0 %v5508_v13  ;;  %5160 = vmatprep.subr.bf16.mxu1 %v5562_v52 }
 0x3ab   :  { %v2629_v53 = vpop.f32.mrb[138].mxu1  ;;  %v6463_v2 = vld [vmem:[#allocation3 + $0x18] sm:$0xff] }
 0x3ac   :  { %2699 = vst.msk [vmem:[#allocation3 + $0x48] sm:$0xff] %vm1716_vm2, %v2687_v40  ;;  %v2666_v47 = vadd.f32 %v6359_v26, %v2645_v5  ;;  %v2646_v54 = vadd.f32 %v2629_v53, %v6354_v23  ;;  %v5037_v56 = vpop.f32.mrb[139].mxu1  ;;  %v5510_v23 = vld [vmem:[%s6660_s5 + $0x78] sm:$0xff]   ;;  %v5539_v5 = vld [vmem:[%s6662_s7 + $0x8] sm:$0xff]  }
 0x3ad   :  { %5073 = vmatpush3.bf16.msra.mxu0 %v5508_v13  ;;  %5161 = vmatpush3.bf16.msra.mxu1 %v5536_v50 }
 0x3ae   :  { %v2667_v19 = vadd.f32 %v6359_v26, %v2646_v54  ;;  %5082 = vmatprep.subr.bf16.mxu0 %v5509_v44  ;;  %v2680_v58 = vmax.f32 %v2666_v47, 0.0  ;;  %5162 = vmatprep.subr.bf16.mxu1 %v5562_v52  ;;  %v2702_v26 = vld [vmem:[#allocation3 + $0x8] sm:$0xff] }
 0x3b0   :  { %v2681_v35 = vmax.f32 %v2667_v19, 0.0  ;;  %v5540_v19 = vld [vmem:[%s6662_s7 + $0x10] sm:$0xff]  }
 0x3b1   :  { %5163 = vmatpush3.bf16.msra.mxu1 %v5537_v27 }
 0x3b2   :  { %v2688_v61 = vpack.c.bf16 %v2681_v35, %v2680_v58  ;;  %5168 = vmatprep.subr.bf16.mxu1 %v5562_v52  ;;  %v5541_v35 = vld [vmem:[%s6662_s7 + $0x18] sm:$0xff]  }
 0x3b3   :  { %v2722_v55 = vld [vmem:[#allocation3 + $0x48] sm:$0xff] }
 0x3b4   :  { %2700 = vst.msk [vmem:[#allocation3 + $0x20] sm:$0xff] %vm1716_vm2, %v2688_v61  ;;  %5057 = vmatmul.mubr.msk.bf16.gmra.mrb[32].mxu0 %vm1716_vm2, %v2722_v55  ;;  %v5543_v61 = vld [vmem:[%s6662_s7 + $0x28] sm:$0xff]  }
 0x3b5   :  { %5074 = vmatprep.mubr.msk.bf16.mxu0 %vm1716_vm2, %v2701_v57  ;;  %v5542_v57 = vld [vmem:[%s6662_s7 + $0x20] sm:$0xff]  }
 0x3bb   :  { %v2979_v12 = vld [vmem:[#allocation3 + $0x20] sm:$0xff] }
 0x3bc   :  { %5075 = vmatmul.mubr.msk.bf16.vlgmr.msra.gmra.mrb[28].mxu0 %vm1716_vm2, %v2702_v26 }
 0x3bd   :  { %5083 = vmatpush3.bf16.msra.mxu0 %v5509_v44  ;;  %5078 = vmatprep.mubr.msk.bf16.mxu0 %vm1716_vm2, %v6453_v0 }
 0x3be   :  { %5084 = vmatprep.subr.bf16.mxu0 %v5510_v23 }
 0x3c1   :  { %5085 = vmatpush3.bf16.msra.mxu0 %v5510_v23  ;;  %v5545_v23 = vld [vmem:[%s6662_s7 + $0x38] sm:$0xff]  }
 0x3c2   :  { %5086 = vmatprep.subr.bf16.mxu0 %v5511_v59 }
 0x3c4   :  { %5079 = vmatmul.mubr.msk.bf16.gmra.mrb[32].mxu0 %vm1716_vm2, %v6463_v2 }
 0x3c5   :  { %5087 = vmatpush3.bf16.msra.mxu0 %v5511_v59  ;;  %5096 = vmatprep.mubr.msk.bf16.mxu0 %vm1716_vm2, %v2702_v26  ;;  %v5546_v26 = vld [vmem:[%s6662_s7 + $0x80] sm:$0xff]   ;;  %v5548_v59 = vld [vmem:[%s6662_s7 + $0x90] sm:$0xff]  }
 0x3c6   :  { %5088 = vmatprep.subr.bf16.mxu0 %v5512_v60 }
 0x3c9   :  { %5089 = vmatpush3.bf16.msra.mxu0 %v5512_v60  ;;  %v5549_v60 = vld [vmem:[%s6662_s7 + $0x98] sm:$0xff]  }
 0x3ca   :  { %5090 = vmatprep.subr.bf16.mxu0 %v5513_v62 }
 0x3cd   :  { %5091 = vmatpush3.bf16.msra.mxu0 %v5513_v62  ;;  %v5551_v62 = vld [vmem:[%s6662_s7 + $0xa8] sm:$0xff]  }
 0x3ce   :  { %5092 = vmatprep.subr.bf16.mxu0 %v5514_v3 }
 0x3d1   :  { %5093 = vmatpush3.bf16.msra.mxu0 %v5514_v3  ;;  %v5552_v3 = vld [vmem:[%s6662_s7 + $0xb0] sm:$0xff]  }
 0x3d2   :  { %5094 = vmatprep.subr.bf16.mxu0 %v5515_v6 }
 0x3d5   :  { %5095 = vmatpush3.bf16.msra.mxu0 %v5515_v6  ;;  %v5553_v6 = vld [vmem:[%s6662_s7 + $0xb8] sm:$0xff]  }
 0x3d6   :  { %5104 = vmatprep.subr.bf16.mxu0 %v5516_v1 }
 0x3d8   :  { %5097 = vmatmul.mubr.msk.bf16.vlgmr.msra.gmra.mrb[28].mxu0 %vm1716_vm2, %v6453_v0 }
 0x3d9   :  { %5100 = vmatprep.mubr.msk.bf16.mxu0 %vm1716_vm2, %v6463_v2  ;;  %5105 = vmatpush3.bf16.msra.mxu0 %v5516_v1  ;;  %v5554_v1 = vld [vmem:[%s6662_s7 + $0xc0] sm:$0xff]  }
 0x3da   :  { %5106 = vmatprep.subr.bf16.mxu0 %v5517_v8 }
 0x3dd   :  { %5107 = vmatpush3.bf16.msra.mxu0 %v5517_v8  ;;  %v5555_v8 = vld [vmem:[%s6662_s7 + $0xc8] sm:$0xff]  }
 0x3de   :  { %5108 = vmatprep.subr.bf16.mxu0 %v5518_v9 }
 0x3e0   :  { %5101 = vmatmul.mubr.msk.bf16.gmra.mrb[32].mxu0 %vm1716_vm2, %v2979_v12 }
 0x3e1   :  { %5109 = vmatpush3.bf16.msra.mxu0 %v5518_v9  ;;  %5118 = vmatprep.mubr.msk.bf16.mxu0 %vm1716_vm2, %v6372_v63  ;;  %v5523_v63 = vld [vmem:[%s6660_s5 + $0xe0] sm:$0xff]   ;;  %v5556_v9 = vld [vmem:[%s6662_s7 + $0xd0] sm:$0xff]  }
 0x3e2   :  { %5110 = vmatprep.subr.bf16.mxu0 %v5519_v11 }
 0x3e5   :  { %5111 = vmatpush3.bf16.msra.mxu0 %v5519_v11  ;;  %v5557_v11 = vld [vmem:[%s6662_s7 + $0xd8] sm:$0xff]  }
 0x3e6   :  { %5112 = vmatprep.subr.bf16.mxu0 %v5520_v4 }
 0x3e9   :  { %5113 = vmatpush3.bf16.msra.mxu0 %v5520_v4  ;;  %v5559_v4 = vld [vmem:[%s6662_s7 + $0xe8] sm:$0xff]  }
 0x3ea   :  { %5114 = vmatprep.subr.bf16.mxu0 %v5521_v14 }
 0x3ed   :  { %5115 = vmatpush3.bf16.msra.mxu0 %v5521_v14  ;;  %v5560_v14 = vld [vmem:[%s6662_s7 + $0xf0] sm:$0xff]  }
 0x3ee   :  { %5116 = vmatprep.subr.bf16.mxu0 %v5522_v15 }
 0x3f1   :  { %5117 = vmatpush3.bf16.msra.mxu0 %v5522_v15  ;;  %v5561_v15 = vld [vmem:[%s6662_s7 + $0xf8] sm:$0xff]  }
 0x3f2   :  { %5126 = vmatprep.subr.bf16.mxu0 %v5523_v63 }
 0x3f4   :  { %5119 = vmatmul.mubr.msk.bf16.vlgmr.msra.gmra.mrb[28].mxu0 %vm1716_vm2, %v6413_v41 }
 0x3f5   :  { %5122 = vmatprep.mubr.msk.bf16.mxu0 %vm1716_vm2, %v2722_v55  ;;  %5127 = vmatpush3.bf16.msra.mxu0 %v5523_v63  ;;  %v5544_v55 = vld [vmem:[%s6662_s7 + $0x30] sm:$0xff]  }
 0x3f6   :  { %5128 = vmatprep.subr.bf16.mxu0 %v5524_v17 }
 0x3f9   :  { %5129 = vmatpush3.bf16.msra.mxu0 %v5524_v17 }
 0x3fa   :  { %5130 = vmatprep.subr.bf16.mxu0 %v5525_v38 }
 0x3fc   :  { %5123 = vmatmul.mubr.msk.bf16.gmra.mrb[32].mxu0 %vm1716_vm2, %v3125_v18 }
 0x3fd   :  { %5131 = vmatpush3.bf16.msra.mxu0 %v5525_v38  ;;  %5140 = vmatprep.mubr.msk.bf16.mxu0 %vm1716_vm2, %v6453_v0  ;;  %v5547_v0 = vld [vmem:[%s6662_s7 + $0x88] sm:$0xff]  }
 0x3fe   :  { %5132 = vmatprep.subr.bf16.mxu0 %v5526_v21 }
 0x401   :  { %5133 = vmatpush3.bf16.msra.mxu0 %v5526_v21 }
 0x402   :  { %5134 = vmatprep.subr.bf16.mxu0 %v5527_v22 }
 0x405   :  { %5135 = vmatpush3.bf16.msra.mxu0 %v5527_v22 }
 0x406   :  { %5136 = vmatprep.subr.bf16.mxu0 %v5528_v24 }
 0x409   :  { %5137 = vmatpush3.bf16.msra.mxu0 %v5528_v24 }
 0x40a   :  { %5138 = vmatprep.subr.bf16.mxu0 %v5529_v25 }
 0x40d   :  { %5139 = vmatpush3.bf16.msra.mxu0 %v5529_v25 }
 0x410   :  { %5141 = vmatmul.mubr.msk.bf16.vlgmr.msra.gmra.mrb[28].mxu0 %vm1716_vm2, %v6463_v2  ;;  %v5550_v2 = vld [vmem:[%s6662_s7 + $0xa0] sm:$0xff]  }
 0x411   :  { %5144 = vmatprep.mubr.msk.bf16.mxu0 %vm1716_vm2, %v2979_v12  ;;  %v5558_v12 = vld [vmem:[%s6662_s7 + $0xe0] sm:$0xff]  }
 0x418   :  { %5145 = vmatmul.mubr.msk.bf16.gmra.mrb[32].mxu0 %vm1716_vm2, %v3271_v7 }
 0x4e3   :  { %v5142_v29 = vpop.f32.mrb[28].mxu0 }
 0x4e4   :  { %v3423_v30 = vadd.f32 %v5142_v29, %v4345_v28  ;;  %v3375_v10 = vpop.f32.mrb[29].mxu0 }
 0x4e5   :  { %v3421_v31 = vadd.f32 %v4345_v28, %v3375_v10  ;;  %v5143_v32 = vpop.f32.mrb[30].mxu0 }
 0x4e6   :  { %v3424_v33 = vadd.f32 %v5143_v32, %v4345_v28  ;;  %v3378_v34 = vpop.f32.mrb[31].mxu0  ;;  %v3431_v39 = vmax.f32 %v3423_v30, 0.0 }
 0x4e7   :  { %v3422_v37 = vadd.f32 %v4345_v28, %v3378_v34  ;;  %v3429_v42 = vmax.f32 %v3421_v31, 0.0 }
 0x4e8   :  { %v3432_v41 = vmax.f32 %v3424_v33, 0.0  ;;  %v4426_v33 = vld [vmem:[%s6664_s8] ss:$0 sm:$0xff] }
 0x4e9   :  { %v3430_v43 = vmax.f32 %v3422_v37, 0.0 }
 0x4ea   :  { %v3438_v13 = vpack.c.bf16 %v3432_v41, %v3431_v39 }
 0x4eb   :  { %v3437_v36 = vpack.c.bf16 %v3430_v43, %v3429_v42  ;;  %v5146_v46 = vpop.f32.mrb[32].mxu0 }
 0x4ec   :  { %v3427_v16 = vadd.f32 %v5146_v46, %v4345_v28  ;;  %v3391_v48 = vpop.f32.mrb[33].mxu0  ;;  %5165 = vmatmul.mubr.bf16.vlgmr.msra.gmra.mrb[140].mxu1 %v3438_v13 }
 0x4ed   :  { %v3425_v49 = vadd.f32 %v4345_v28, %v3391_v48  ;;  %5169 = vmatpush3.bf16.msra.mxu1 %v5538_v45  ;;  %v5147_v40 = vpop.f32.mrb[34].mxu0  ;;  %5184 = vmatprep.mubr.msk.bf16.mxu1 %vm5564_vm3, %v5562_v52 }
 0x4ee   :  { %v3428_v20 = vadd.f32 %v5147_v40, %v4345_v28  ;;  %v3394_v44 = vpop.f32.mrb[35].mxu0  ;;  %5170 = vmatprep.subr.bf16.mxu1 %v5562_v52  ;;  %v3435_v51 = vmax.f32 %v3427_v16, 0.0 }
 0x4ef   :  { %v3426_v53 = vadd.f32 %v4345_v28, %v3394_v44  ;;  %v3433_v54 = vmax.f32 %v3425_v49, 0.0 }
 0x4f0   :  { %v3436_v47 = vmax.f32 %v3428_v20, 0.0 }
 0x4f1   :  { %v3434_v56 = vmax.f32 %v3426_v53, 0.0  ;;  %5171 = vmatpush3.bf16.msra.mxu1 %v5539_v5 }
 0x4f2   :  { %v6555_v50 = vpack.c.bf16 %v3436_v47, %v3435_v51  ;;  %5172 = vmatprep.subr.bf16.mxu1 %v5562_v52 }
 0x4f3   :  { %v3439_v58 = vpack.c.bf16 %v3434_v56, %v3433_v54 }
 0x4f5   :  { %5173 = vmatpush3.bf16.msra.mxu1 %v5540_v19 }
 0x4f6   :  { %5174 = vmatprep.subr.bf16.mxu1 %v5562_v52 }
 0x4f9   :  { %5175 = vmatpush3.bf16.msra.mxu1 %v5541_v35 }
 0x4fa   :  { %5176 = vmatprep.subr.bf16.mxu1 %v5562_v52 }
 0x4fd   :  { %5177 = vmatpush3.bf16.msra.mxu1 %v5542_v57 }
 0x4fe   :  { %5178 = vmatprep.subr.bf16.mxu1 %v5562_v52 }
 0x501   :  { %5179 = vmatpush3.bf16.msra.mxu1 %v5543_v61 }
 0x502   :  { %5180 = vmatprep.subr.bf16.mxu1 %v5562_v52 }
 0x505   :  { %5181 = vmatpush3.bf16.msra.mxu1 %v5544_v55 }
 0x506   :  { %5182 = vmatprep.subr.bf16.mxu1 %v5562_v52 }
 0x509   :  { %5183 = vmatpush3.bf16.msra.mxu1 %v5545_v23 }
 0x50a   :  { %5188 = vmatprep.subr.bf16.mxu1 %v5562_v52 }
 0x50c   :  { %5185 = vmatmul.mubr.bf16.vlgmr.msra.gmra.mrb[144].mxu1 %v3437_v36 }
 0x50d   :  { %5189 = vmatpush3.bf16.msra.mxu1 %v5546_v26  ;;  %5204 = vmatprep.mubr.msk.bf16.mxu1 %vm5564_vm3, %v5562_v52 }
 0x50e   :  { %5190 = vmatprep.subr.bf16.mxu1 %v5562_v52 }
 0x511   :  { %5191 = vmatpush3.bf16.msra.mxu1 %v5547_v0 }
 0x512   :  { %5192 = vmatprep.subr.bf16.mxu1 %v5562_v52 }
 0x515   :  { %5193 = vmatpush3.bf16.msra.mxu1 %v5548_v59 }
 0x516   :  { %5194 = vmatprep.subr.bf16.mxu1 %v5562_v52 }
 0x519   :  { %5195 = vmatpush3.bf16.msra.mxu1 %v5549_v60 }
 0x51a   :  { %5196 = vmatprep.subr.bf16.mxu1 %v5562_v52 }
 0x51d   :  { %5197 = vmatpush3.bf16.msra.mxu1 %v5550_v2 }
 0x51e   :  { %5198 = vmatprep.subr.bf16.mxu1 %v5562_v52 }
 0x521   :  { %5199 = vmatpush3.bf16.msra.mxu1 %v5551_v62 }
 0x522   :  { %5200 = vmatprep.subr.bf16.mxu1 %v5562_v52 }
 0x525   :  { %5201 = vmatpush3.bf16.msra.mxu1 %v5552_v3 }
 0x526   :  { %5202 = vmatprep.subr.bf16.mxu1 %v5562_v52 }
 0x529   :  { %5203 = vmatpush3.bf16.msra.mxu1 %v5553_v6 }
 0x52a   :  { %5208 = vmatprep.subr.bf16.mxu1 %v5562_v52 }
 0x52c   :  { %5205 = vmatmul.mubr.bf16.vlgmr.msra.gmra.mrb[148].mxu1 %v3439_v58 }
 0x52d   :  { %5209 = vmatpush3.bf16.msra.mxu1 %v5554_v1  ;;  %5224 = vmatprep.mubr.msk.bf16.mxu1 %vm5564_vm3, %v5562_v52 }
 0x52e   :  { %5210 = vmatprep.subr.bf16.mxu1 %v5562_v52 }
 0x531   :  { %5211 = vmatpush3.bf16.msra.mxu1 %v5555_v8 }
 0x532   :  { %5212 = vmatprep.subr.bf16.mxu1 %v5562_v52 }
 0x535   :  { %5213 = vmatpush3.bf16.msra.mxu1 %v5556_v9 }
 0x536   :  { %5214 = vmatprep.subr.bf16.mxu1 %v5562_v52 }
 0x539   :  { %5215 = vmatpush3.bf16.msra.mxu1 %v5557_v11 }
 0x53a   :  { %5216 = vmatprep.subr.bf16.mxu1 %v5562_v52 }
 0x53d   :  { %5217 = vmatpush3.bf16.msra.mxu1 %v5558_v12 }
 0x53e   :  { %5218 = vmatprep.subr.bf16.mxu1 %v5562_v52 }
 0x541   :  { %5219 = vmatpush3.bf16.msra.mxu1 %v5559_v4 }
 0x542   :  { %5220 = vmatprep.subr.bf16.mxu1 %v5562_v52 }
 0x545   :  { %5221 = vmatpush3.bf16.msra.mxu1 %v5560_v14 }
 0x546   :  { %5222 = vmatprep.subr.bf16.mxu1 %v5562_v52 }
 0x549   :  { %5223 = vmatpush3.bf16.msra.mxu1 %v5561_v15 }
 0x54c   :  { %5225 = vmatmul.mubr.bf16.vlgmr.msra.gmra.mrb[152].mxu1 %v6555_v50 }
 0x5bf   :  { %v3556_v63 = vpop.f32.mrb[140].mxu1 }
 0x5c0   :  { %v5166_v17 = vpop.f32.mrb[141].mxu1 }
 0x5c1   :  { %v3559_v38 = vpop.f32.mrb[142].mxu1 }
 0x5c2   :  { %v5167_v18 = vpop.f32.mrb[143].mxu1 }
 0x5df   :  { %v3645_v21 = vpop.f32.mrb[144].mxu1 }
 0x5e0   :  { %v3646_v22 = vadd.f32 %v3645_v21, %v3556_v63  ;;  %v5186_v24 = vpop.f32.mrb[145].mxu1 }
 0x5e1   :  { %v3648_v25 = vpop.f32.mrb[146].mxu1 }
 0x5e2   :  { %v3649_v7 = vadd.f32 %v3648_v25, %v3559_v38  ;;  %v5187_v27 = vpop.f32.mrb[147].mxu1 }
 0x5ff   :  { %v3751_v28 = vpop.f32.mrb[148].mxu1 }
 0x600   :  { %v3758_v29 = vadd.f32 %v3751_v28, %v3646_v22  ;;  %v5206_v30 = vpop.f32.mrb[149].mxu1 }
 0x601   :  { %v3754_v10 = vpop.f32.mrb[150].mxu1 }
 0x602   :  { %v3759_v31 = vadd.f32 %v3754_v10, %v3649_v7  ;;  %v5207_v32 = vpop.f32.mrb[151].mxu1 }
 0x61f   :  { %v3859_v52 = vpop.f32.mrb[152].mxu1 }
 0x620   :  { %v3866_v34 = vadd.f32 %v3859_v52, %v3758_v29  ;;  %v5226_v37 = vpop.f32.mrb[153].mxu1 }
 0x621   :  { %v3862_v39 = vpop.f32.mrb[154].mxu1 }
 0x622   :  { %v3875_v41 = vadd.f32 %v4426_v33, %v3866_v34  ;;  %v3867_v42 = vadd.f32 %v3862_v39, %v3759_v31  ;;  %v5227_v43 = vpop.f32.mrb[155].mxu1 }
 0x624   :  { %3878 = vst.msk [vmem:[%s6665_s9] sm:$0xff] %vm3877_vm4, %v3875_v41  ;;  %v3876_v45 = vadd.f32 %v4426_v33, %v3867_v42 }
 0x626   :  { %3879 = vst.msk [vmem:[%s6665_s9 + $0x8] sm:$0xff] %vm3877_vm4, %v3876_v45 }

</bundles_post_ra>
